<compile_context>
chip_gen: v6e
topology: v6e:2x2x1
jax: 0.10.0
libtpu: 0.0.40
codegen_flags: <defaults>
</compile_context>

<pallas_src>
import jax
import jax.numpy as jnp
from jax import lax
from jax.experimental import pallas as pl
from jax.experimental.pallas import tpu as pltpu

# ----------------------------- model config ---------------------------------
NUM_LAYERS = 2
NUM_HEADS = 4
DIM = 32
FFN_DIM = 64
VOCAB = 64
BLOCK_SIZE = 16

BATCH = 2
SEQ = 8
HEAD_DIM = DIM // NUM_HEADS
LN_EPS = 1e-5

ROWS = BATCH * SEQ            # 16 activation rows processed together
LANES = 128                   # lane width all packed params are padded to

# ---------------- packed parameter slab layout (static row offsets) ----------
# Weight slab rows per layer: [wqkv(32) | wo(32) | w1(32) | w2(64)], then head_w(32).
W_QKV_OFF = 0
W_O_OFF = DIM                               # 32
W_1_OFF = 2 * DIM                           # 64
W_2_OFF = 3 * DIM                           # 96
W_LAYER_STRIDE = 3 * DIM + FFN_DIM          # 160
W_HEAD_OFF = NUM_LAYERS * W_LAYER_STRIDE    # 320
W_ROWS = W_HEAD_OFF + DIM                   # 352

# Bias/LN slab: one 128-wide row per vector, 8 rows per layer, then head bias.
(B_QKV, B_O, B_LN1W, B_LN1B, B_F1, B_F2, B_LN2W, B_LN2B) = range(8)
B_LAYER_STRIDE = 8
B_HEAD_OFF = NUM_LAYERS * B_LAYER_STRIDE    # 16
B_ROWS = ((B_HEAD_OFF + 1 + 7) // 8) * 8    # 24 (sublane aligned)


# ------------------------------ kernel ---------------------------------------
def _layer_norm(x, w, b):
    mu = jnp.mean(x, axis=-1, keepdims=True)
    var = jnp.mean(jnp.square(x - mu), axis=-1, keepdims=True)
    return (x - mu) * lax.rsqrt(var + LN_EPS) * w + b


def fused_transformer_kernel(idx_ref, tok_ref, pos_ref, w_ref, b_ref, out_ref):
    """idx:[ROWS,1] i32, tok:[VOCAB,DIM], pos:[BLOCK_SIZE,DIM],
       w:[W_ROWS,128], b:[B_ROWS,128] -> out:[ROWS,128] (lanes 0:VOCAB real)."""

    def wmat(row, nrows):                       # [nrows, 128] full-lane weight view
        return w_ref[row:row + nrows, :]

    def brow(row):                              # [1, 128] zero-padded bias row
        return b_ref[row:row + 1, :]

    def bvec(row, n):                           # [1, n] LayerNorm param row
        return b_ref[row:row + 1, 0:n]

    def split_heads(y):
        # [ROWS, 128] (cols = part*DIM + h*HEAD_DIM + d) -> q/k/v each
        # [BATCH*NUM_HEADS, SEQ, HEAD_DIM], using only tile-aligned reshapes
        # and last-two-dim transposes.
        y = y.reshape(BATCH, SEQ, LANES)                         # (b, s, c)
        y = jnp.transpose(y, (0, 2, 1))                          # (b, c, s)
        y = y.reshape(BATCH, LANES // HEAD_DIM, HEAD_DIM, SEQ)   # (b, g, d, s)
        y = jnp.transpose(y, (0, 1, 3, 2))                       # (b, g, s, d)
        q = y[:, 0:NUM_HEADS].reshape(BATCH * NUM_HEADS, SEQ, HEAD_DIM)
        k = y[:, NUM_HEADS:2 * NUM_HEADS].reshape(BATCH * NUM_HEADS, SEQ, HEAD_DIM)
        v = y[:, 2 * NUM_HEADS:3 * NUM_HEADS].reshape(BATCH * NUM_HEADS, SEQ, HEAD_DIM)
        return q, k, v

    def merge_heads(o):
        # [BATCH*NUM_HEADS, SEQ, HEAD_DIM] -> [ROWS, DIM]
        # (matches PyTorch attn_output.transpose(1, 2).contiguous().view(B, S, D))
        o = jnp.transpose(o, (0, 2, 1))                          # (bh, d, s)
        o = o.reshape(BATCH, DIM, SEQ)                           # (b, h*hd+d, s)
        o = jnp.transpose(o, (0, 2, 1))                          # (b, s, h*hd+d)
        return o.reshape(ROWS, DIM)

    # ---- embeddings fused in-kernel: token gather as a one-hot matmul ----
    ids = idx_ref[...]                                                     # [ROWS, 1]
    onehot = (lax.broadcasted_iota(jnp.int32, (ROWS, VOCAB), 1) == ids
              ).astype(jnp.float32)                                        # [ROWS, VOCAB]
    x = jnp.dot(onehot, tok_ref[...], preferred_element_type=jnp.float32)  # [ROWS, DIM]
    pos = jnp.broadcast_to(pos_ref[0:SEQ, :], (BATCH, SEQ, DIM))
    x = x + pos.reshape(ROWS, DIM)

    # ---- additive causal mask, built ONCE, reused by every head/layer ----
    r_i = lax.broadcasted_iota(jnp.int32, (SEQ, SEQ), 0)
    c_i = lax.broadcasted_iota(jnp.int32, (SEQ, SEQ), 1)
    mask_add = jnp.where(c_i <= r_i, 0.0, -10000.0).astype(jnp.float32)[None]  # [1,S,S]

    for layer in range(NUM_LAYERS):                    # static unroll (2 layers)
        wb = layer * W_LAYER_STRIDE
        bb = layer * B_LAYER_STRIDE

        # fused QKV projection: [16,32] @ [32,128] (lanes 0:96 real, rest zero)
        qkv = (jnp.dot(x, wmat(wb + W_QKV_OFF, DIM),
                       preferred_element_type=jnp.float32) + brow(bb + B_QKV))
        qb, kb, vb = split_heads(qkv)

        # all heads in one batched einsum pair; NO 1/sqrt(d_k) (reference bug kept)
        s = jnp.einsum('bqd,bkd->bqk', qb, kb, preferred_element_type=jnp.float32)
        s = s + mask_add                               # == masked_fill(mask==0, -1e4)
        s = s - jnp.max(s, axis=-1, keepdims=True)
        p = jnp.exp(s)
        p = p / jnp.sum(p, axis=-1, keepdims=True)     # exact softmax denominator
        # TODO(synk): F.dropout(attn_weights, p=0.1) is stochastic in the reference;
        #             implemented as identity (eval / deterministic semantics).
        o = jnp.einsum('bqk,bkd->bqd', p, vb, preferred_element_type=jnp.float32)
        attn = merge_heads(o)

        # out projection -> residual -> post-LN1
        proj = (jnp.dot(attn, wmat(wb + W_O_OFF, DIM),
                        preferred_element_type=jnp.float32) + brow(bb + B_O))
        x = _layer_norm(x + proj[:, 0:DIM],
                        bvec(bb + B_LN1W, DIM), bvec(bb + B_LN1B, DIM))

        # FFN: fc1 -> ReLU -> (dropout=id) -> fc2 -> residual -> post-LN2
        h1 = (jnp.dot(x, wmat(wb + W_1_OFF, DIM),
                      preferred_element_type=jnp.float32) + brow(bb + B_F1))
        h1 = jnp.maximum(h1[:, 0:FFN_DIM], 0.0)
        ffn = (jnp.dot(h1, wmat(wb + W_2_OFF, FFN_DIM),
                       preferred_element_type=jnp.float32) + brow(bb + B_F2))
        x = _layer_norm(x + ffn[:, 0:DIM],
                        bvec(bb + B_LN2W, DIM), bvec(bb + B_LN2B, DIM))

    # NOTE: the reference forward never applies ln_f before the head (bug preserved).
    # Lane-dense 128-wide store (head weight/bias zero-padded beyond VOCAB).
    out_ref[...] = (jnp.dot(x, wmat(W_HEAD_OFF, DIM),
                            preferred_element_type=jnp.float32) + brow(B_HEAD_OFF))


# ------------------------------ wrapper ---------------------------------------
@jax.jit
def transformer_forward(idx, params):
    """idx: [B, S] int -> logits [B, S, VOCAB] float32 (targets=None path)."""
    idx2d = idx.reshape(ROWS, 1).astype(jnp.int32)
    vmem = pl.BlockSpec(memory_space=pltpu.MemorySpace.VMEM)
    out = pl.pallas_call(
        fused_transformer_kernel,
        out_shape=jax.ShapeDtypeStruct((ROWS, LANES), jnp.float32),
        in_specs=[vmem] * 5,
        out_specs=vmem,
        compiler_params=pltpu.CompilerParams(vmem_limit_bytes=32 * 1024 * 1024),
    )(idx2d, params["token_emb"], params["pos_emb"],
      params["w_slab"], params["b_slab"])
    return out[:, :VOCAB].reshape(BATCH, SEQ, VOCAB)


# --------------------------- parameter packing --------------------------------
def _pad_to_lanes(a):
    """[c] or [r, c] -> [r, 128] zero-padded along the lane (last) dim."""
    a = jnp.asarray(a, jnp.float32)
    if a.ndim == 1:
        a = a[None, :]
    return jnp.pad(a, ((0, 0), (0, LANES - a.shape[1])))


def pack_params(token_emb, pos_emb, blocks, head_w, head_b):
    """Pack all weights into one [352,128] slab and all bias/LN vectors into one
    [24,128] slab (a handful of DMAs instead of ~28 tiny transfers)."""
    w_parts, b_parts = [], []
    for blk in blocks:
        w_parts += [_pad_to_lanes(blk["wqkv"]), _pad_to_lanes(blk["wo"]),
                    _pad_to_lanes(blk["w1"]), _pad_to_lanes(blk["w2"])]
        b_parts += [_pad_to_lanes(blk[k]) for k in
                    ("bqkv", "bo", "ln1w", "ln1b", "b1", "b2", "ln2w", "ln2b")]
    w_parts.append(_pad_to_lanes(head_w))
    b_parts.append(_pad_to_lanes(head_b))
    w_slab = jnp.concatenate(w_parts, axis=0)
    b_slab = jnp.concatenate(b_parts, axis=0)
    b_slab = jnp.pad(b_slab, ((0, B_ROWS - b_slab.shape[0]), (0, 0)))
    assert w_slab.shape == (W_ROWS, LANES)
    assert b_slab.shape == (B_ROWS, LANES)
    return {"token_emb": jnp.asarray(token_emb, jnp.float32),
            "pos_emb": jnp.asarray(pos_emb, jnp.float32),
            "w_slab": w_slab, "b_slab": b_slab}


def init_params(key):
    keys = iter(jax.random.split(key, 64))

    def linear_w(shape, std=0.1):
        # stored as [in, out] (pre-transposed relative to PyTorch's [out, in])
        return jax.random.normal(next(keys), shape, jnp.float32) * std

    token_emb = jax.random.normal(next(keys), (VOCAB, DIM), jnp.float32) * 0.02
    pos_emb = jax.random.normal(next(keys), (BLOCK_SIZE, DIM), jnp.float32) * 0.02
    blocks = []
    for _ in range(NUM_LAYERS):
        wq = linear_w((DIM, DIM))
        wk = linear_w((DIM, DIM))
        wv = linear_w((DIM, DIM))
        blocks.append(dict(
            wqkv=jnp.concatenate([wq, wk, wv], axis=1),          # [DIM, 3*DIM]
            bqkv=jnp.zeros((3 * DIM,), jnp.float32),
            wo=linear_w((DIM, DIM)), bo=jnp.zeros((DIM,), jnp.float32),
            ln1w=jnp.ones((DIM,), jnp.float32), ln1b=jnp.zeros((DIM,), jnp.float32),
            w1=linear_w((DIM, FFN_DIM)), b1=jnp.zeros((FFN_DIM,), jnp.float32),
            w2=linear_w((FFN_DIM, DIM)), b2=jnp.zeros((DIM,), jnp.float32),
            ln2w=jnp.ones((DIM,), jnp.float32), ln2b=jnp.zeros((DIM,), jnp.float32),
        ))
    head_w = linear_w((DIM, VOCAB))
    head_b = jnp.zeros((VOCAB,), jnp.float32)
    return pack_params(token_emb, pos_emb, blocks, head_w, head_b)


# -------------------------------- main ----------------------------------------
if __name__ == "__main__":
    key = jax.random.PRNGKey(0)
    pkey, ikey = jax.random.split(key)

    params = init_params(pkey)
    idx = jax.random.randint(ikey, (BATCH, SEQ), 0, VOCAB, dtype=jnp.int32)

    logits = transformer_forward(idx, params)
    logits = jax.block_until_ready(logits)

    assert logits.shape == (BATCH, SEQ, VOCAB)
    assert logits.dtype == jnp.float32
    assert bool(jnp.all(jnp.isfinite(logits)))

    print("KERNEL_OK")
</pallas_src>

<mosaic_0001>
module attributes {stable_mosaic.version = 11 : i64} {
  func.func @fused_transformer_kernel(%arg0: memref<16x1xi32, #tpu.memory_space<vmem>>, %arg1: memref<64x32xf32, #tpu.memory_space<vmem>>, %arg2: memref<16x32xf32, #tpu.memory_space<vmem>>, %arg3: memref<352x128xf32, #tpu.memory_space<vmem>>, %arg4: memref<24x128xf32, #tpu.memory_space<vmem>>, %arg5: memref<16x128xf32, #tpu.memory_space<vmem>>) attributes {dimension_semantics = [], scalar_prefetch = 0 : i64, scratch_operands = 0 : i64, tpu.core_type = #tpu.core_type<tc>} {
    %c0 = arith.constant 0 : index
    %c0_0 = arith.constant 0 : index
    %0 = vector.load %arg0[%c0, %c0_0] : memref<16x1xi32, #tpu.memory_space<vmem>>, vector<16x1xi32>
    %1 = tpu.iota {dimensions = array<i32: 1>} : vector<16x64xi32>
    %2 = vector.broadcast %0 : vector<16x1xi32> to vector<16x64xi32>
    %3 = arith.cmpi eq, %1, %2 : vector<16x64xi32>
    %4 = arith.extui %3 : vector<16x64xi1> to vector<16x64xi32>
    %5 = arith.sitofp %4 : vector<16x64xi32> to vector<16x64xf32>
    %c0_1 = arith.constant 0 : index
    %c0_2 = arith.constant 0 : index
    %6 = vector.load %arg1[%c0_1, %c0_2] : memref<64x32xf32, #tpu.memory_space<vmem>>, vector<64x32xf32>
    %cst = arith.constant dense<0.000000e+00> : vector<16x32xf32>
    %7 = tpu.matmul %5, %6, %cst {dimension_numbers = #tpu.dot_dimension_numbers<[1], [0], [0], [1], [0, 0, 1, 1], [], []>} : vector<16x64xf32>, vector<64x32xf32>, vector<16x32xf32> -> vector<16x32xf32>
    %c0_3 = arith.constant 0 : index
    %c0_4 = arith.constant 0 : index
    %8 = vector.load %arg2[%c0_3, %c0_4] : memref<16x32xf32, #tpu.memory_space<vmem>>, vector<8x32xf32>
    %9 = vector.shape_cast %8 : vector<8x32xf32> to vector<1x8x32xf32>
    %10 = vector.broadcast %9 : vector<1x8x32xf32> to vector<2x8x32xf32>
    %11 = vector.shape_cast %10 : vector<2x8x32xf32> to vector<16x32xf32>
    %12 = arith.addf %7, %11 : vector<16x32xf32>
    %13 = tpu.iota {dimensions = array<i32: 0>} : vector<8x8xi32>
    %14 = tpu.iota {dimensions = array<i32: 1>} : vector<8x8xi32>
    %15 = arith.cmpi sle, %14, %13 : vector<8x8xi32>
    %cst_5 = arith.constant 0.000000e+00 : f32
    %cst_6 = arith.constant -1.000000e+04 : f32
    %16 = vector.broadcast %cst_5 : f32 to vector<8x8xf32>
    %17 = vector.broadcast %cst_6 : f32 to vector<8x8xf32>
    %18 = arith.select %15, %16, %17 : vector<8x8xi1>, vector<8x8xf32>
    %19 = vector.shape_cast %18 : vector<8x8xf32> to vector<1x8x8xf32>
    %c0_7 = arith.constant 0 : index
    %c0_8 = arith.constant 0 : index
    %20 = vector.load %arg3[%c0_7, %c0_8] : memref<352x128xf32, #tpu.memory_space<vmem>>, vector<32x128xf32>
    %cst_9 = arith.constant dense<0.000000e+00> : vector<16x128xf32>
    %21 = tpu.matmul %12, %20, %cst_9 {dimension_numbers = #tpu.dot_dimension_numbers<[1], [0], [0], [1], [0, 0, 1, 1], [], []>} : vector<16x32xf32>, vector<32x128xf32>, vector<16x128xf32> -> vector<16x128xf32>
    %c0_10 = arith.constant 0 : index
    %c0_11 = arith.constant 0 : index
    %22 = vector.load %arg4[%c0_10, %c0_11] : memref<24x128xf32, #tpu.memory_space<vmem>>, vector<1x128xf32>
    %23 = vector.broadcast %22 : vector<1x128xf32> to vector<16x128xf32>
    %24 = arith.addf %21, %23 : vector<16x128xf32>
    %25 = vector.shape_cast %24 : vector<16x128xf32> to vector<2x8x128xf32>
    %26 = tpu.transpose %25, [0, 2, 1] : vector<2x8x128xf32> -> vector<2x128x8xf32>
    %27 = vector.shape_cast %26 : vector<2x128x8xf32> to vector<2x16x8x8xf32>
    %28 = tpu.transpose %27, [0, 1, 3, 2] : vector<2x16x8x8xf32> -> vector<2x16x8x8xf32>
    %29 = vector.extract_strided_slice %28 {offsets = [0, 0, 0, 0], sizes = [2, 4, 8, 8], strides = [1, 1, 1, 1]} : vector<2x16x8x8xf32> to vector<2x4x8x8xf32>
    %30 = vector.shape_cast %29 : vector<2x4x8x8xf32> to vector<8x8x8xf32>
    %31 = vector.extract_strided_slice %28 {offsets = [0, 4, 0, 0], sizes = [2, 4, 8, 8], strides = [1, 1, 1, 1]} : vector<2x16x8x8xf32> to vector<2x4x8x8xf32>
    %32 = vector.shape_cast %31 : vector<2x4x8x8xf32> to vector<8x8x8xf32>
    %33 = vector.extract_strided_slice %28 {offsets = [0, 8, 0, 0], sizes = [2, 4, 8, 8], strides = [1, 1, 1, 1]} : vector<2x16x8x8xf32> to vector<2x4x8x8xf32>
    %34 = vector.shape_cast %33 : vector<2x4x8x8xf32> to vector<8x8x8xf32>
    "tpu.trace_start"() <{level = 10 : i32, message = "bqd,bkd->bqk"}> : () -> ()
    %cst_12 = arith.constant dense<0.000000e+00> : vector<8x8x8xf32>
    %35 = tpu.matmul %30, %32, %cst_12 {dimension_numbers = #tpu.dot_dimension_numbers<[2], [2], [1], [1], [0, 0, 0, 1, 1, 1], [0], [0]>} : vector<8x8x8xf32>, vector<8x8x8xf32>, vector<8x8x8xf32> -> vector<8x8x8xf32>
    "tpu.trace_stop"() : () -> ()
    %36 = vector.broadcast %19 : vector<1x8x8xf32> to vector<8x8x8xf32>
    %37 = arith.addf %35, %36 : vector<8x8x8xf32>
    %cst_13 = arith.constant dense<0xFF800000> : vector<8x8xf32>
    %38 = vector.multi_reduction <maximumf>, %37, %cst_13 [2] : vector<8x8x8xf32> to vector<8x8xf32>
    %39 = vector.shape_cast %38 : vector<8x8xf32> to vector<8x8x1xf32>
    %40 = vector.broadcast %39 : vector<8x8x1xf32> to vector<8x8x8xf32>
    %41 = arith.subf %37, %40 : vector<8x8x8xf32>
    %42 = math.exp %41 : vector<8x8x8xf32>
    %cst_14 = arith.constant dense<0.000000e+00> : vector<8x8xf32>
    %43 = vector.multi_reduction <add>, %42, %cst_14 [2] : vector<8x8x8xf32> to vector<8x8xf32>
    %44 = vector.shape_cast %43 : vector<8x8xf32> to vector<8x8x1xf32>
    %45 = vector.broadcast %44 : vector<8x8x1xf32> to vector<8x8x8xf32>
    %46 = arith.divf %42, %45 : vector<8x8x8xf32>
    "tpu.trace_start"() <{level = 10 : i32, message = "bqk,bkd->bqd"}> : () -> ()
    %cst_15 = arith.constant dense<0.000000e+00> : vector<8x8x8xf32>
    %47 = tpu.matmul %46, %34, %cst_15 {dimension_numbers = #tpu.dot_dimension_numbers<[2], [1], [1], [2], [0, 0, 0, 1, 1, 2], [0], [0]>} : vector<8x8x8xf32>, vector<8x8x8xf32>, vector<8x8x8xf32> -> vector<8x8x8xf32>
    "tpu.trace_stop"() : () -> ()
    %48 = tpu.transpose %47, [0, 2, 1] : vector<8x8x8xf32> -> vector<8x8x8xf32>
    %49 = vector.shape_cast %48 : vector<8x8x8xf32> to vector<2x32x8xf32>
    %50 = tpu.transpose %49, [0, 2, 1] : vector<2x32x8xf32> -> vector<2x8x32xf32>
    %51 = vector.shape_cast %50 : vector<2x8x32xf32> to vector<16x32xf32>
    %c32 = arith.constant 32 : index
    %c0_16 = arith.constant 0 : index
    %52 = vector.load %arg3[%c32, %c0_16] : memref<352x128xf32, #tpu.memory_space<vmem>>, vector<32x128xf32>
    %cst_17 = arith.constant dense<0.000000e+00> : vector<16x128xf32>
    %53 = tpu.matmul %51, %52, %cst_17 {dimension_numbers = #tpu.dot_dimension_numbers<[1], [0], [0], [1], [0, 0, 1, 1], [], []>} : vector<16x32xf32>, vector<32x128xf32>, vector<16x128xf32> -> vector<16x128xf32>
    %c1 = arith.constant 1 : index
    %c0_18 = arith.constant 0 : index
    %54 = vector.load %arg4[%c1, %c0_18] : memref<24x128xf32, #tpu.memory_space<vmem>>, vector<1x128xf32>
    %55 = vector.broadcast %54 : vector<1x128xf32> to vector<16x128xf32>
    %56 = arith.addf %53, %55 : vector<16x128xf32>
    %57 = vector.extract_strided_slice %56 {offsets = [0, 0], sizes = [16, 32], strides = [1, 1]} : vector<16x128xf32> to vector<16x32xf32>
    %58 = arith.addf %12, %57 : vector<16x32xf32>
    %c2 = arith.constant 2 : index
    %c0_19 = arith.constant 0 : index
    %59 = vector.load %arg4[%c2, %c0_19] : memref<24x128xf32, #tpu.memory_space<vmem>>, vector<1x32xf32>
    %c3 = arith.constant 3 : index
    %c0_20 = arith.constant 0 : index
    %60 = vector.load %arg4[%c3, %c0_20] : memref<24x128xf32, #tpu.memory_space<vmem>>, vector<1x32xf32>
    %cst_21 = arith.constant dense<0.000000e+00> : vector<16xf32>
    %61 = vector.multi_reduction <add>, %58, %cst_21 [1] : vector<16x32xf32> to vector<16xf32>
    %62 = vector.shape_cast %61 : vector<16xf32> to vector<16x1xf32>
    %cst_22 = arith.constant 3.200000e+01 : f32
    %63 = vector.broadcast %cst_22 : f32 to vector<16x1xf32>
    %64 = arith.divf %62, %63 : vector<16x1xf32>
    %65 = vector.broadcast %64 : vector<16x1xf32> to vector<16x32xf32>
    %66 = arith.subf %58, %65 : vector<16x32xf32>
    %67 = arith.mulf %66, %66 : vector<16x32xf32>
    %cst_23 = arith.constant dense<0.000000e+00> : vector<16xf32>
    %68 = vector.multi_reduction <add>, %67, %cst_23 [1] : vector<16x32xf32> to vector<16xf32>
    %69 = vector.shape_cast %68 : vector<16xf32> to vector<16x1xf32>
    %cst_24 = arith.constant 3.200000e+01 : f32
    %70 = vector.broadcast %cst_24 : f32 to vector<16x1xf32>
    %71 = arith.divf %69, %70 : vector<16x1xf32>
    %72 = vector.broadcast %64 : vector<16x1xf32> to vector<16x32xf32>
    %73 = arith.subf %58, %72 : vector<16x32xf32>
    %cst_25 = arith.constant 9.99999974E-6 : f32
    %74 = vector.broadcast %cst_25 : f32 to vector<16x1xf32>
    %75 = arith.addf %71, %74 : vector<16x1xf32>
    %76 = math.rsqrt %75 : vector<16x1xf32>
    %77 = vector.broadcast %76 : vector<16x1xf32> to vector<16x32xf32>
    %78 = arith.mulf %73, %77 : vector<16x32xf32>
    %79 = vector.broadcast %59 : vector<1x32xf32> to vector<16x32xf32>
    %80 = arith.mulf %78, %79 : vector<16x32xf32>
    %81 = vector.broadcast %60 : vector<1x32xf32> to vector<16x32xf32>
    %82 = arith.addf %80, %81 : vector<16x32xf32>
    %c64 = arith.constant 64 : index
    %c0_26 = arith.constant 0 : index
    %83 = vector.load %arg3[%c64, %c0_26] : memref<352x128xf32, #tpu.memory_space<vmem>>, vector<32x128xf32>
    %cst_27 = arith.constant dense<0.000000e+00> : vector<16x128xf32>
    %84 = tpu.matmul %82, %83, %cst_27 {dimension_numbers = #tpu.dot_dimension_numbers<[1], [0], [0], [1], [0, 0, 1, 1], [], []>} : vector<16x32xf32>, vector<32x128xf32>, vector<16x128xf32> -> vector<16x128xf32>
    %c4 = arith.constant 4 : index
    %c0_28 = arith.constant 0 : index
    %85 = vector.load %arg4[%c4, %c0_28] : memref<24x128xf32, #tpu.memory_space<vmem>>, vector<1x128xf32>
    %86 = vector.broadcast %85 : vector<1x128xf32> to vector<16x128xf32>
    %87 = arith.addf %84, %86 : vector<16x128xf32>
    %88 = vector.extract_strided_slice %87 {offsets = [0, 0], sizes = [16, 64], strides = [1, 1]} : vector<16x128xf32> to vector<16x64xf32>
    %cst_29 = arith.constant 0.000000e+00 : f32
    %89 = vector.broadcast %cst_29 : f32 to vector<16x64xf32>
    %90 = arith.maximumf %88, %89 : vector<16x64xf32>
    %c96 = arith.constant 96 : index
    %c0_30 = arith.constant 0 : index
    %91 = vector.load %arg3[%c96, %c0_30] : memref<352x128xf32, #tpu.memory_space<vmem>>, vector<64x128xf32>
    %cst_31 = arith.constant dense<0.000000e+00> : vector<16x128xf32>
    %92 = tpu.matmul %90, %91, %cst_31 {dimension_numbers = #tpu.dot_dimension_numbers<[1], [0], [0], [1], [0, 0, 1, 1], [], []>} : vector<16x64xf32>, vector<64x128xf32>, vector<16x128xf32> -> vector<16x128xf32>
    %c5 = arith.constant 5 : index
    %c0_32 = arith.constant 0 : index
    %93 = vector.load %arg4[%c5, %c0_32] : memref<24x128xf32, #tpu.memory_space<vmem>>, vector<1x128xf32>
    %94 = vector.broadcast %93 : vector<1x128xf32> to vector<16x128xf32>
    %95 = arith.addf %92, %94 : vector<16x128xf32>
    %96 = vector.extract_strided_slice %95 {offsets = [0, 0], sizes = [16, 32], strides = [1, 1]} : vector<16x128xf32> to vector<16x32xf32>
    %97 = arith.addf %82, %96 : vector<16x32xf32>
    %c6 = arith.constant 6 : index
    %c0_33 = arith.constant 0 : index
    %98 = vector.load %arg4[%c6, %c0_33] : memref<24x128xf32, #tpu.memory_space<vmem>>, vector<1x32xf32>
    %c7 = arith.constant 7 : index
    %c0_34 = arith.constant 0 : index
    %99 = vector.load %arg4[%c7, %c0_34] : memref<24x128xf32, #tpu.memory_space<vmem>>, vector<1x32xf32>
    %cst_35 = arith.constant dense<0.000000e+00> : vector<16xf32>
    %100 = vector.multi_reduction <add>, %97, %cst_35 [1] : vector<16x32xf32> to vector<16xf32>
    %101 = vector.shape_cast %100 : vector<16xf32> to vector<16x1xf32>
    %cst_36 = arith.constant 3.200000e+01 : f32
    %102 = vector.broadcast %cst_36 : f32 to vector<16x1xf32>
    %103 = arith.divf %101, %102 : vector<16x1xf32>
    %104 = vector.broadcast %103 : vector<16x1xf32> to vector<16x32xf32>
    %105 = arith.subf %97, %104 : vector<16x32xf32>
    %106 = arith.mulf %105, %105 : vector<16x32xf32>
    %cst_37 = arith.constant dense<0.000000e+00> : vector<16xf32>
    %107 = vector.multi_reduction <add>, %106, %cst_37 [1] : vector<16x32xf32> to vector<16xf32>
    %108 = vector.shape_cast %107 : vector<16xf32> to vector<16x1xf32>
    %cst_38 = arith.constant 3.200000e+01 : f32
    %109 = vector.broadcast %cst_38 : f32 to vector<16x1xf32>
    %110 = arith.divf %108, %109 : vector<16x1xf32>
    %111 = vector.broadcast %103 : vector<16x1xf32> to vector<16x32xf32>
    %112 = arith.subf %97, %111 : vector<16x32xf32>
    %cst_39 = arith.constant 9.99999974E-6 : f32
    %113 = vector.broadcast %cst_39 : f32 to vector<16x1xf32>
    %114 = arith.addf %110, %113 : vector<16x1xf32>
    %115 = math.rsqrt %114 : vector<16x1xf32>
    %116 = vector.broadcast %115 : vector<16x1xf32> to vector<16x32xf32>
    %117 = arith.mulf %112, %116 : vector<16x32xf32>
    %118 = vector.broadcast %98 : vector<1x32xf32> to vector<16x32xf32>
    %119 = arith.mulf %117, %118 : vector<16x32xf32>
    %120 = vector.broadcast %99 : vector<1x32xf32> to vector<16x32xf32>
    %121 = arith.addf %119, %120 : vector<16x32xf32>
    %c160 = arith.constant 160 : index
    %c0_40 = arith.constant 0 : index
    %122 = vector.load %arg3[%c160, %c0_40] : memref<352x128xf32, #tpu.memory_space<vmem>>, vector<32x128xf32>
    %cst_41 = arith.constant dense<0.000000e+00> : vector<16x128xf32>
    %123 = tpu.matmul %121, %122, %cst_41 {dimension_numbers = #tpu.dot_dimension_numbers<[1], [0], [0], [1], [0, 0, 1, 1], [], []>} : vector<16x32xf32>, vector<32x128xf32>, vector<16x128xf32> -> vector<16x128xf32>
    %c8 = arith.constant 8 : index
    %c0_42 = arith.constant 0 : index
    %124 = vector.load %arg4[%c8, %c0_42] : memref<24x128xf32, #tpu.memory_space<vmem>>, vector<1x128xf32>
    %125 = vector.broadcast %124 : vector<1x128xf32> to vector<16x128xf32>
    %126 = arith.addf %123, %125 : vector<16x128xf32>
    %127 = vector.shape_cast %126 : vector<16x128xf32> to vector<2x8x128xf32>
    %128 = tpu.transpose %127, [0, 2, 1] : vector<2x8x128xf32> -> vector<2x128x8xf32>
    %129 = vector.shape_cast %128 : vector<2x128x8xf32> to vector<2x16x8x8xf32>
    %130 = tpu.transpose %129, [0, 1, 3, 2] : vector<2x16x8x8xf32> -> vector<2x16x8x8xf32>
    %131 = vector.extract_strided_slice %130 {offsets = [0, 0, 0, 0], sizes = [2, 4, 8, 8], strides = [1, 1, 1, 1]} : vector<2x16x8x8xf32> to vector<2x4x8x8xf32>
    %132 = vector.shape_cast %131 : vector<2x4x8x8xf32> to vector<8x8x8xf32>
    %133 = vector.extract_strided_slice %130 {offsets = [0, 4, 0, 0], sizes = [2, 4, 8, 8], strides = [1, 1, 1, 1]} : vector<2x16x8x8xf32> to vector<2x4x8x8xf32>
    %134 = vector.shape_cast %133 : vector<2x4x8x8xf32> to vector<8x8x8xf32>
    %135 = vector.extract_strided_slice %130 {offsets = [0, 8, 0, 0], sizes = [2, 4, 8, 8], strides = [1, 1, 1, 1]} : vector<2x16x8x8xf32> to vector<2x4x8x8xf32>
    %136 = vector.shape_cast %135 : vector<2x4x8x8xf32> to vector<8x8x8xf32>
    "tpu.trace_start"() <{level = 10 : i32, message = "bqd,bkd->bqk"}> : () -> ()
    %cst_43 = arith.constant dense<0.000000e+00> : vector<8x8x8xf32>
    %137 = tpu.matmul %132, %134, %cst_43 {dimension_numbers = #tpu.dot_dimension_numbers<[2], [2], [1], [1], [0, 0, 0, 1, 1, 1], [0], [0]>} : vector<8x8x8xf32>, vector<8x8x8xf32>, vector<8x8x8xf32> -> vector<8x8x8xf32>
    "tpu.trace_stop"() : () -> ()
    %138 = vector.broadcast %19 : vector<1x8x8xf32> to vector<8x8x8xf32>
    %139 = arith.addf %137, %138 : vector<8x8x8xf32>
    %cst_44 = arith.constant dense<0xFF800000> : vector<8x8xf32>
    %140 = vector.multi_reduction <maximumf>, %139, %cst_44 [2] : vector<8x8x8xf32> to vector<8x8xf32>
    %141 = vector.shape_cast %140 : vector<8x8xf32> to vector<8x8x1xf32>
    %142 = vector.broadcast %141 : vector<8x8x1xf32> to vector<8x8x8xf32>
    %143 = arith.subf %139, %142 : vector<8x8x8xf32>
    %144 = math.exp %143 : vector<8x8x8xf32>
    %cst_45 = arith.constant dense<0.000000e+00> : vector<8x8xf32>
    %145 = vector.multi_reduction <add>, %144, %cst_45 [2] : vector<8x8x8xf32> to vector<8x8xf32>
    %146 = vector.shape_cast %145 : vector<8x8xf32> to vector<8x8x1xf32>
    %147 = vector.broadcast %146 : vector<8x8x1xf32> to vector<8x8x8xf32>
    %148 = arith.divf %144, %147 : vector<8x8x8xf32>
    "tpu.trace_start"() <{level = 10 : i32, message = "bqk,bkd->bqd"}> : () -> ()
    %cst_46 = arith.constant dense<0.000000e+00> : vector<8x8x8xf32>
    %149 = tpu.matmul %148, %136, %cst_46 {dimension_numbers = #tpu.dot_dimension_numbers<[2], [1], [1], [2], [0, 0, 0, 1, 1, 2], [0], [0]>} : vector<8x8x8xf32>, vector<8x8x8xf32>, vector<8x8x8xf32> -> vector<8x8x8xf32>
    "tpu.trace_stop"() : () -> ()
    %150 = tpu.transpose %149, [0, 2, 1] : vector<8x8x8xf32> -> vector<8x8x8xf32>
    %151 = vector.shape_cast %150 : vector<8x8x8xf32> to vector<2x32x8xf32>
    %152 = tpu.transpose %151, [0, 2, 1] : vector<2x32x8xf32> -> vector<2x8x32xf32>
    %153 = vector.shape_cast %152 : vector<2x8x32xf32> to vector<16x32xf32>
    %c192 = arith.constant 192 : index
    %c0_47 = arith.constant 0 : index
    %154 = vector.load %arg3[%c192, %c0_47] : memref<352x128xf32, #tpu.memory_space<vmem>>, vector<32x128xf32>
    %cst_48 = arith.constant dense<0.000000e+00> : vector<16x128xf32>
    %155 = tpu.matmul %153, %154, %cst_48 {dimension_numbers = #tpu.dot_dimension_numbers<[1], [0], [0], [1], [0, 0, 1, 1], [], []>} : vector<16x32xf32>, vector<32x128xf32>, vector<16x128xf32> -> vector<16x128xf32>
    %c9 = arith.constant 9 : index
    %c0_49 = arith.constant 0 : index
    %156 = vector.load %arg4[%c9, %c0_49] : memref<24x128xf32, #tpu.memory_space<vmem>>, vector<1x128xf32>
    %157 = vector.broadcast %156 : vector<1x128xf32> to vector<16x128xf32>
    %158 = arith.addf %155, %157 : vector<16x128xf32>
    %159 = vector.extract_strided_slice %158 {offsets = [0, 0], sizes = [16, 32], strides = [1, 1]} : vector<16x128xf32> to vector<16x32xf32>
    %160 = arith.addf %121, %159 : vector<16x32xf32>
    %c10 = arith.constant 10 : index
    %c0_50 = arith.constant 0 : index
    %161 = vector.load %arg4[%c10, %c0_50] : memref<24x128xf32, #tpu.memory_space<vmem>>, vector<1x32xf32>
    %c11 = arith.constant 11 : index
    %c0_51 = arith.constant 0 : index
    %162 = vector.load %arg4[%c11, %c0_51] : memref<24x128xf32, #tpu.memory_space<vmem>>, vector<1x32xf32>
    %cst_52 = arith.constant dense<0.000000e+00> : vector<16xf32>
    %163 = vector.multi_reduction <add>, %160, %cst_52 [1] : vector<16x32xf32> to vector<16xf32>
    %164 = vector.shape_cast %163 : vector<16xf32> to vector<16x1xf32>
    %cst_53 = arith.constant 3.200000e+01 : f32
    %165 = vector.broadcast %cst_53 : f32 to vector<16x1xf32>
    %166 = arith.divf %164, %165 : vector<16x1xf32>
    %167 = vector.broadcast %166 : vector<16x1xf32> to vector<16x32xf32>
    %168 = arith.subf %160, %167 : vector<16x32xf32>
    %169 = arith.mulf %168, %168 : vector<16x32xf32>
    %cst_54 = arith.constant dense<0.000000e+00> : vector<16xf32>
    %170 = vector.multi_reduction <add>, %169, %cst_54 [1] : vector<16x32xf32> to vector<16xf32>
    %171 = vector.shape_cast %170 : vector<16xf32> to vector<16x1xf32>
    %cst_55 = arith.constant 3.200000e+01 : f32
    %172 = vector.broadcast %cst_55 : f32 to vector<16x1xf32>
    %173 = arith.divf %171, %172 : vector<16x1xf32>
    %174 = vector.broadcast %166 : vector<16x1xf32> to vector<16x32xf32>
    %175 = arith.subf %160, %174 : vector<16x32xf32>
    %cst_56 = arith.constant 9.99999974E-6 : f32
    %176 = vector.broadcast %cst_56 : f32 to vector<16x1xf32>
    %177 = arith.addf %173, %176 : vector<16x1xf32>
    %178 = math.rsqrt %177 : vector<16x1xf32>
    %179 = vector.broadcast %178 : vector<16x1xf32> to vector<16x32xf32>
    %180 = arith.mulf %175, %179 : vector<16x32xf32>
    %181 = vector.broadcast %161 : vector<1x32xf32> to vector<16x32xf32>
    %182 = arith.mulf %180, %181 : vector<16x32xf32>
    %183 = vector.broadcast %162 : vector<1x32xf32> to vector<16x32xf32>
    %184 = arith.addf %182, %183 : vector<16x32xf32>
    %c224 = arith.constant 224 : index
    %c0_57 = arith.constant 0 : index
    %185 = vector.load %arg3[%c224, %c0_57] : memref<352x128xf32, #tpu.memory_space<vmem>>, vector<32x128xf32>
    %cst_58 = arith.constant dense<0.000000e+00> : vector<16x128xf32>
    %186 = tpu.matmul %184, %185, %cst_58 {dimension_numbers = #tpu.dot_dimension_numbers<[1], [0], [0], [1], [0, 0, 1, 1], [], []>} : vector<16x32xf32>, vector<32x128xf32>, vector<16x128xf32> -> vector<16x128xf32>
    %c12 = arith.constant 12 : index
    %c0_59 = arith.constant 0 : index
    %187 = vector.load %arg4[%c12, %c0_59] : memref<24x128xf32, #tpu.memory_space<vmem>>, vector<1x128xf32>
    %188 = vector.broadcast %187 : vector<1x128xf32> to vector<16x128xf32>
    %189 = arith.addf %186, %188 : vector<16x128xf32>
    %190 = vector.extract_strided_slice %189 {offsets = [0, 0], sizes = [16, 64], strides = [1, 1]} : vector<16x128xf32> to vector<16x64xf32>
    %cst_60 = arith.constant 0.000000e+00 : f32
    %191 = vector.broadcast %cst_60 : f32 to vector<16x64xf32>
    %192 = arith.maximumf %190, %191 : vector<16x64xf32>
    %c256 = arith.constant 256 : index
    %c0_61 = arith.constant 0 : index
    %193 = vector.load %arg3[%c256, %c0_61] : memref<352x128xf32, #tpu.memory_space<vmem>>, vector<64x128xf32>
    %cst_62 = arith.constant dense<0.000000e+00> : vector<16x128xf32>
    %194 = tpu.matmul %192, %193, %cst_62 {dimension_numbers = #tpu.dot_dimension_numbers<[1], [0], [0], [1], [0, 0, 1, 1], [], []>} : vector<16x64xf32>, vector<64x128xf32>, vector<16x128xf32> -> vector<16x128xf32>
    %c13 = arith.constant 13 : index
    %c0_63 = arith.constant 0 : index
    %195 = vector.load %arg4[%c13, %c0_63] : memref<24x128xf32, #tpu.memory_space<vmem>>, vector<1x128xf32>
    %196 = vector.broadcast %195 : vector<1x128xf32> to vector<16x128xf32>
    %197 = arith.addf %194, %196 : vector<16x128xf32>
    %198 = vector.extract_strided_slice %197 {offsets = [0, 0], sizes = [16, 32], strides = [1, 1]} : vector<16x128xf32> to vector<16x32xf32>
    %199 = arith.addf %184, %198 : vector<16x32xf32>
    %c14 = arith.constant 14 : index
    %c0_64 = arith.constant 0 : index
    %200 = vector.load %arg4[%c14, %c0_64] : memref<24x128xf32, #tpu.memory_space<vmem>>, vector<1x32xf32>
    %c15 = arith.constant 15 : index
    %c0_65 = arith.constant 0 : index
    %201 = vector.load %arg4[%c15, %c0_65] : memref<24x128xf32, #tpu.memory_space<vmem>>, vector<1x32xf32>
    %cst_66 = arith.constant dense<0.000000e+00> : vector<16xf32>
    %202 = vector.multi_reduction <add>, %199, %cst_66 [1] : vector<16x32xf32> to vector<16xf32>
    %203 = vector.shape_cast %202 : vector<16xf32> to vector<16x1xf32>
    %cst_67 = arith.constant 3.200000e+01 : f32
    %204 = vector.broadcast %cst_67 : f32 to vector<16x1xf32>
    %205 = arith.divf %203, %204 : vector<16x1xf32>
    %206 = vector.broadcast %205 : vector<16x1xf32> to vector<16x32xf32>
    %207 = arith.subf %199, %206 : vector<16x32xf32>
    %208 = arith.mulf %207, %207 : vector<16x32xf32>
    %cst_68 = arith.constant dense<0.000000e+00> : vector<16xf32>
    %209 = vector.multi_reduction <add>, %208, %cst_68 [1] : vector<16x32xf32> to vector<16xf32>
    %210 = vector.shape_cast %209 : vector<16xf32> to vector<16x1xf32>
    %cst_69 = arith.constant 3.200000e+01 : f32
    %211 = vector.broadcast %cst_69 : f32 to vector<16x1xf32>
    %212 = arith.divf %210, %211 : vector<16x1xf32>
    %213 = vector.broadcast %205 : vector<16x1xf32> to vector<16x32xf32>
    %214 = arith.subf %199, %213 : vector<16x32xf32>
    %cst_70 = arith.constant 9.99999974E-6 : f32
    %215 = vector.broadcast %cst_70 : f32 to vector<16x1xf32>
    %216 = arith.addf %212, %215 : vector<16x1xf32>
    %217 = math.rsqrt %216 : vector<16x1xf32>
    %218 = vector.broadcast %217 : vector<16x1xf32> to vector<16x32xf32>
    %219 = arith.mulf %214, %218 : vector<16x32xf32>
    %220 = vector.broadcast %200 : vector<1x32xf32> to vector<16x32xf32>
    %221 = arith.mulf %219, %220 : vector<16x32xf32>
    %222 = vector.broadcast %201 : vector<1x32xf32> to vector<16x32xf32>
    %223 = arith.addf %221, %222 : vector<16x32xf32>
    %c320 = arith.constant 320 : index
    %c0_71 = arith.constant 0 : index
    %224 = vector.load %arg3[%c320, %c0_71] : memref<352x128xf32, #tpu.memory_space<vmem>>, vector<32x128xf32>
    %cst_72 = arith.constant dense<0.000000e+00> : vector<16x128xf32>
    %225 = tpu.matmul %223, %224, %cst_72 {dimension_numbers = #tpu.dot_dimension_numbers<[1], [0], [0], [1], [0, 0, 1, 1], [], []>} : vector<16x32xf32>, vector<32x128xf32>, vector<16x128xf32> -> vector<16x128xf32>
    %c16 = arith.constant 16 : index
    %c0_73 = arith.constant 0 : index
    %226 = vector.load %arg4[%c16, %c0_73] : memref<24x128xf32, #tpu.memory_space<vmem>>, vector<1x128xf32>
    %227 = vector.broadcast %226 : vector<1x128xf32> to vector<16x128xf32>
    %228 = arith.addf %225, %227 : vector<16x128xf32>
    %c0_74 = arith.constant 0 : index
    %c0_75 = arith.constant 0 : index
    %229 = vector.load %arg5[%c0_74, %c0_75] : memref<16x128xf32, #tpu.memory_space<vmem>>, vector<16x128xf32>
    tpu.vector_store %arg5[%c0_74, %c0_75], %228 {strides = array<i32>} : memref<16x128xf32, #tpu.memory_space<vmem>>, vector<16x128xf32>,
    return
  }
}

</mosaic_0001>

<bundles_post_ra>
// kernel: transformer_forward.1
= control target key start
LH: loop header
LB: loop body
LE: loop exit
PB: predicated region body
PF: predicated region fallthrough
CT: control target
= control target key end

     0   :  { %10 = vsyncpa [#allocation3], 0  ;;  %s6636_s18 = smov [#allocation2]   ;;  %s7106_s0 = inlined_call_operand.vmem [shape: s32[16,1], index: 0, kind: input, shape index: {}]   ;;  %s7107_s1 = inlined_call_operand.vmem [shape: f32[64,32], index: 1, kind: input, shape index: {}]   ;;  %s7108_s2 = inlined_call_operand.vmem [shape: f32[16,32], index: 2, kind: input, shape index: {}]   ;;  %s7109_s3 = inlined_call_operand.hbm [shape: f32[352,128], index: 3, kind: input, shape index: {}]   ;;  %s7110_s4 = inlined_call_operand.vmem [shape: f32[24,128], index: 4, kind: input, shape index: {}]   ;;  %s7111_s5 = inlined_call_operand.vmem [shape: f32[16,128], index: 5, kind: output, shape index: {}]  }
   0x1   :  { %s22_s19 = sshll.u32 %s6636_s18, 4  ;;  %s23_s19 = int_to_ptr.vmem [resolvable:$true] %s22_s19 }
   0x2   :  { %s6622_s20 = scalar_lea.vmem %s23_s19, 5632  ;;  %p6627_p1 = scmp.lt.s32.totalorder %s23_s19, %s23_s19 }
   0x3   :  { %p6623_p0 = scmp.ne.s32.totalorder %s23_s19, %s6622_s20  ;;  %p6628_p2 = scmp.lt.s32.totalorder %s6622_s20, %s6622_s20 }
   0x5   :  { %p6629_p3 = por %p6628_p2, %p6627_p1 }
   0x7   :  { %p6630_p4 = pnand %p6629_p3, %p6623_p0 }
   0x9   :  { %6633 = shalt.err (!%p6630_p4)
}
   0xa   :  { %s6637_s21 = smov 128   ;;  %s6638_s22 = smov 8  }
   0xb   :  { %28 = dma.hbm_to_vmem [thread:$0]  %s7109_s3, 5632, %s23_s19, [#allocation3], %s6637_s21, %s6637_s21, %s6638_s22  }
   0xc   :  { %6634 = dma.done.wait [#allocation3], 5632  }
   0xd   :  { %6635 = vsyncadd [#allocation3], 4294961664  ;;  %v6639_v0 = vmov 0   ;;  %v34_v1 = vld [vmem:[%s7106_s0] sm:$0xff]  ;;  %v57_v2 = vld [vmem:[%s7107_s1 + $0x38] sm:$0xff]  ;;  %v6640_v12 = vmov 0.0   ;;  %v36_v13 = vlaneseq }
   0xe   :  { %6533 = vset.pattern.permute.xlu0 %v6639_v0  ;;  %6232 = vmatprep.subr.mxu0 %v57_v2  ;;  %v56_v3 = vld [vmem:[%s7107_s1 + $0x30] sm:$0xff]  ;;  %v35_v4 = vld [vmem:[%s7106_s0 + $0x8] sm:$0xff]  ;;  %v148_v6 = vld [vmem:[#allocation2 + $0x18] sm:$0xff]  ;;  %vm59_vm0 = vcmask 523264   ;;  %vm154_vm3 = vcmask 261120   ;;  %vm6641_vm4 = vmmov 0  }
   0xf   :  { %39 = vperm.xlu0 %6533, %v34_v1   ;;  %6233 = vmatpush3.msra.mxu0 %v57_v2  ;;  %v55_v5 = vld [vmem:[%s7107_s1 + $0x28] sm:$0xff]  ;;  %v54_v7 = vld [vmem:[%s7107_s1 + $0x20] sm:$0xff]  ;;  %v53_v8 = vld [vmem:[%s7107_s1 + $0x18] sm:$0xff]  ;;  %v6708_v14 = vand.u32 127, %v36_v13  ;;  %vm1068_vm5 = vcmask 64512  }
  0x10   :  { %6234 = vmatprep.subr.mxu0 %v56_v3  ;;  %6251 = vmatprep.subr.mxu1 %v148_v6  ;;  %v52_v9 = vld [vmem:[%s7107_s1 + $0x10] sm:$0xff]  ;;  %v51_v10 = vld [vmem:[%s7107_s1 + $0x8] sm:$0xff]  ;;  %v50_v11 = vld [vmem:[%s7107_s1] sm:$0xff] }
  0x11   :  { %6235 = vmatpush3.msra.mxu0 %v56_v3  ;;  %6252 = vmatpush3.msra.mxu1 %v148_v6  ;;  %v147_v19 = vld [vmem:[#allocation2 + $0x10] sm:$0xff]  ;;  %v146_v20 = vld [vmem:[#allocation2 + $0x8] sm:$0xff]  ;;  %v145_v21 = vld [vmem:[#allocation2] sm:$0xff] }
  0x12   :  { %6236 = vmatprep.subr.mxu0 %v55_v5  ;;  %6253 = vmatprep.subr.mxu1 %v147_v19  ;;  %v58_v23 = vld [vmem:[%s7108_s2] sm:$0xff] }
  0x13   :  { %42 = vperm.xlu0 %6533, %v35_v4   ;;  %6237 = vmatpush3.msra.mxu0 %v55_v5  ;;  %v6013_v28 = vld [vmem:[%s7110_s4] ss:$0 sm:$0xff] }
  0x14   :  { %6238 = vmatprep.subr.mxu0 %v54_v7  ;;  %6254 = vmatpush3.msra.mxu1 %v147_v19 }
  0x15   :  { %6239 = vmatpush3.msra.mxu0 %v54_v7  ;;  %6255 = vmatprep.subr.mxu1 %v146_v20 }
  0x16   :  { %6240 = vmatprep.subr.mxu0 %v53_v8  ;;  %6256 = vmatpush3.msra.mxu1 %v146_v20 }
  0x17   :  { %6241 = vmatpush3.msra.mxu0 %v53_v8  ;;  %6257 = vmatprep.subr.mxu1 %v145_v21  ;;  %v142_v8 = vshrl.u32 %v36_v13, 7 }
  0x18   :  { %6242 = vmatprep.subr.mxu0 %v52_v9  ;;  %6258 = vmatpush3.msra.mxu1 %v145_v21 }
  0x19   :  { %6243 = vmatpush3.msra.mxu0 %v52_v9  ;;  %6262 = vmatprep.subr.mxu1 %v6640_v12  ;;  %vm143_vm6 = vcmp.le.s32.totalorder %v6708_v14, %v142_v8  ;;  %v6642_v9 = vmov -10000.0  }
  0x1a   :  { %6244 = vmatprep.subr.mxu0 %v51_v10 }
  0x1b   :  { %6245 = vmatpush3.msra.mxu0 %v51_v10  ;;  %v6793_v10 = vsel %vm143_vm6, 0.0, %v6642_v9 }
  0x1c   :  { %6246 = vmatprep.subr.mxu0 %v50_v11 }
  0x1d   :  { %6247 = vmatpush3.msra.mxu0 %v50_v11 }
  0x1e   :  { %6282 = vmatprep.subr.mxu0 %v6640_v12 }
  0x8a   :  { %v40_v15 = vpop.permute.xlu0 %39 }
  0x8b   :  { %vm44_vm1 = vcmp.eq.s32.totalorder %v6708_v14, %v40_v15 }
  0x8c   :  { %v6009_v16 = vsel %vm44_vm1, 1.0, %v6640_v12 }
  0x8d   :  { %6248 = vmatprep.mubr.msk.f32.mxu0 %vm59_vm0, %v6009_v16 }
  0x8e   :  { %v43_v17 = vpop.permute.xlu0 %42 }
  0x8f   :  { %vm45_vm2 = vcmp.eq.s32.totalorder %v6708_v14, %v43_v17 }
  0x90   :  { %v6010_v18 = vsel %vm45_vm2, 1.0, %v6640_v12 }
  0x91   :  { %6249 = vmatmul.mubr.msk.f32.vlgmr.msra.gmra.mxu0 %vm59_vm0, %v6010_v18 }
  0x92   :  { %6284 = vmatprep.mubr.msk.f32.mxu0 %vm6641_vm4, %v6640_v12 }
 0x151   :  { %v6250_v22 = vpop.f32.mrf.mxu0 }
 0x152   :  { %v6722_v26 = vadd.f32 %v6250_v22, %v58_v23 }
 0x153   :  { %v132_v24 = vpop.f32.mrf.mxu0 }
 0x154   :  { %v6720_v25 = vadd.f32 %v132_v24, %v58_v23 }
 0x156   :  { %6259 = vmatprep.mubr.msk.f32.mxu1 %vm154_vm3, %v6720_v25 }
 0x157   :  { %6260 = vmatmul.mubr.msk.f32.vlgmr.msra.gmra.mxu1 %vm154_vm3, %v6722_v26 }
 0x158   :  { %6264 = vmatprep.mubr.msk.f32.mxu1 %vm6641_vm4, %v6640_v12 }
 0x217   :  { %v6261_v27 = vpop.f32.mrf.mxu1 }
 0x218   :  { %v233_v31 = vadd.f32 %v6261_v27, %v6013_v28 }
 0x219   :  { %v227_v29 = vpop.f32.mrf.mxu1 }
 0x21a   :  { %v228_v30 = vadd.f32 %v6013_v28, %v227_v29 }
 0x21c   :  { %236 = vxpose.xlu1.b32.start.end [1/1] (short) (narrow) %v228_v30, 96 }
 0x249   :  { %268 = vxpose.xlu1.b32.start.end [1/1] (short) (narrow) %v233_v31, 96 }
 0x298   :  { %v252_v32 = vpop.trf.xlu1 }
 0x299   :  { %300 = vxpose.xlu0.b32.start.end [1/1] (short) (narrow) %v252_v32, 8 }
 0x29c   :  { %v253_v33 = vpop.trf.xlu1 }
 0x29d   :  { %332 = vxpose.xlu0.b32.start.end [1/1] (short) (narrow) %v253_v33, 8 }
 0x2a0   :  { %v254_v34 = vpop.trf.xlu1 }
 0x2a4   :  { %v255_v35 = vpop.trf.xlu1 }
 0x2a8   :  { %v256_v36 = vpop.trf.xlu1 }
 0x2a9   :  { %428 = vxpose.xlu0.b32.start.end [1/1] (short) (narrow) %v256_v36, 8 }
 0x2ac   :  { %v257_v37 = vpop.trf.xlu1 }
 0x2ad   :  { %460 = vxpose.xlu0.b32.start.end [1/1] (short) (narrow) %v257_v37, 8 }
 0x2b0   :  { %v258_v38 = vpop.trf.xlu1 }
 0x2b1   :  { %364 = vxpose.xlu0.b32.start.end [1/1] (short) (narrow) %v254_v34, 8  ;;  %492 = vxpose.xlu1.b32.start.end [1/1] (short) (narrow) %v258_v38, 8 }
 0x2b4   :  { %v259_v39 = vpop.trf.xlu1 }
 0x2b8   :  { %v6735_v40 = vpop.trf.xlu1 }
 0x2bc   :  { %v6737_v41 = vpop.trf.xlu1 }
 0x2c0   :  { %v6739_v42 = vpop.trf.xlu1 }
 0x2c4   :  { %v6741_v43 = vpop.trf.xlu1 }
 0x2c8   :  { %v284_v44 = vpop.trf.xlu1 }
 0x2cc   :  { %v285_v45 = vpop.trf.xlu1 }
 0x2d0   :  { %v286_v46 = vpop.trf.xlu1 }
 0x2d4   :  { %v287_v47 = vpop.trf.xlu1 }
 0x2d8   :  { %v288_v48 = vpop.trf.xlu1 }
 0x2d9   :  { %812 = vxpose.xlu0.b32.start.end [1/1] (short) (narrow) %v288_v48, 8 }
 0x2dc   :  { %v289_v49 = vpop.trf.xlu1 }
 0x2dd   :  { %396 = vxpose.xlu0.b32.start.end [1/1] (short) (narrow) %v255_v35, 8 }
 0x2e0   :  { %v290_v50 = vpop.trf.xlu1 }
 0x2e1   :  { %844 = vxpose.xlu0.b32.start.end [1/1] (short) (narrow) %v289_v49, 8 }
 0x2e4   :  { %v291_v51 = vpop.trf.xlu1 }
 0x2e5   :  { %684 = vxpose.xlu0.b32.start.end [1/1] (short) (narrow) %v284_v44, 8 }
 0x2e8   :  { %v6743_v52 = vpop.trf.xlu1 }
 0x2e9   :  { %876 = vxpose.xlu0.b32.start.end [1/1] (short) (narrow) %v290_v50, 8 }
 0x2ec   :  { %v6745_v54 = vpop.trf.xlu1 }
 0x2ed   :  { %716 = vxpose.xlu0.b32.start.end [1/1] (short) (narrow) %v285_v45, 8 }
 0x2f0   :  { %v6747_v56 = vpop.trf.xlu1 }
 0x2f1   :  { %524 = vxpose.xlu0.b32.start.end [1/1] (short) (narrow) %v259_v39, 8 }
 0x2f4   :  { %v6751_v58 = vpop.trf.xlu1 }
 0x2f5   :  { %908 = vxpose.xlu0.b32.start.end [1/1] (short) (narrow) %v291_v51, 8 }
 0x2f9   :  { %748 = vxpose.xlu0.b32.start.end [1/1] (short) (narrow) %v286_v46, 8 }
 0x2fd   :  { %780 = vxpose.xlu0.b32.start.end [1/1] (short) (narrow) %v287_v47, 8 }
 0x315   :  { %v316_v53 = vpop.trf.xlu0 }
 0x319   :  { %v348_v55 = vpop.trf.xlu0 }
 0x325   :  { %v444_v57 = vpop.trf.xlu0 }
 0x326   :  { %6263 = vmatpush3.xpose.msk.msra.mxu1 %vm1068_vm5, %v444_v57 }
 0x327   :  { %6267 = vmatprep.subr.mxu1 %v6640_v12 }
 0x329   :  { %6265 = vmatmul.mubr.msk.f32.vlgmr.msra.gmra.mxu1 %vm1068_vm5, %v316_v53  ;;  %v476_v59 = vpop.trf.xlu0 }
 0x32a   :  { %6268 = vmatpush3.xpose.msk.msra.mxu1 %vm1068_vm5, %v476_v59  ;;  %6269 = vmatprep.mubr.msk.f32.mxu1 %vm6641_vm4, %v6640_v12 }
 0x32b   :  { %6272 = vmatprep.subr.mxu1 %v6640_v12 }
 0x32d   :  { %6270 = vmatmul.mubr.msk.f32.vlgmr.msra.gmra.mxu1 %vm1068_vm5, %v348_v55  ;;  %v508_v60 = vpop.trf.xlu1  ;;  %v380_v61 = vpop.trf.xlu0 }
 0x32e   :  { %6273 = vmatpush3.xpose.msk.msra.mxu1 %vm1068_vm5, %v508_v60  ;;  %6274 = vmatprep.mubr.msk.f32.mxu1 %vm6641_vm4, %v6640_v12 }
 0x32f   :  { %6277 = vmatprep.subr.mxu1 %v6640_v12 }
 0x331   :  { %6275 = vmatmul.mubr.msk.f32.vlgmr.msra.gmra.mxu1 %vm1068_vm5, %v380_v61 }
 0x332   :  { %6279 = vmatprep.mubr.msk.f32.mxu1 %vm6641_vm4, %v6640_v12 }
 0x355   :  { %v828_v62 = vpop.trf.xlu0 }
 0x356   :  { %6283 = vmatpush3.xpose.msk.msra.mxu0 %vm1068_vm5, %v828_v62 }
 0x357   :  { %6292 = vmatprep.subr.mxu0 %v6640_v12 }
 0x359   :  { %v412_v63 = vpop.trf.xlu0 }
 0x35d   :  { %v860_v0 = vpop.trf.xlu0 }
 0x361   :  { %v700_v1 = vpop.trf.xlu0 }
 0x362   :  { %6285 = vmatmul.mubr.msk.f32.vlgmr.msra.gmra.mxu0 %vm1068_vm5, %v700_v1 }
 0x363   :  { %6294 = vmatprep.mubr.msk.f32.mxu0 %vm6641_vm4, %v6640_v12 }
 0x365   :  { %v892_v2 = vpop.trf.xlu0 }
 0x366   :  { %6293 = vmatpush3.xpose.msk.msra.mxu0 %vm1068_vm5, %v892_v2 }
 0x367   :  { %6302 = vmatprep.subr.mxu0 %v6640_v12 }
 0x369   :  { %v732_v3 = vpop.trf.xlu0 }
 0x36d   :  { %v540_v4 = vpop.trf.xlu0 }
 0x36e   :  { %6278 = vmatpush3.xpose.msk.msra.mxu1 %vm1068_vm5, %v540_v4 }
 0x36f   :  { %6287 = vmatprep.subr.mxu1 %v6640_v12 }
 0x371   :  { %v924_v5 = vpop.trf.xlu0  ;;  %6280 = vmatmul.mubr.msk.f32.vlgmr.msra.gmra.mxu1 %vm1068_vm5, %v412_v63 }
 0x372   :  { %6288 = vmatpush3.xpose.msk.msra.mxu1 %vm1068_vm5, %v860_v0  ;;  %6289 = vmatprep.mubr.msk.f32.mxu1 %vm6641_vm4, %v6640_v12 }
 0x373   :  { %6297 = vmatprep.subr.mxu1 %v6640_v12 }
 0x375   :  { %v764_v6 = vpop.trf.xlu0  ;;  %6290 = vmatmul.mubr.msk.f32.vlgmr.msra.gmra.mxu1 %vm1068_vm5, %v732_v3 }
 0x376   :  { %6295 = vmatmul.mubr.msk.f32.vlgmr.msra.gmra.mxu0 %vm1068_vm5, %v764_v6  ;;  %6298 = vmatpush3.xpose.msk.msra.mxu1 %vm1068_vm5, %v924_v5 }
 0x377   :  { %6299 = vmatprep.mubr.msk.f32.mxu1 %vm6641_vm4, %v6640_v12  ;;  %6307 = vmatprep.subr.mxu1 %v6640_v12 }
 0x378   :  { %6304 = vmatprep.mubr.msk.f32.mxu0 %vm6641_vm4, %v6640_v12 }
 0x379   :  { %v796_v7 = vpop.trf.xlu0 }
 0x37a   :  { %6300 = vmatmul.mubr.msk.f32.vlgmr.msra.gmra.mxu1 %vm1068_vm5, %v796_v7 }
 0x37b   :  { %6309 = vmatprep.mubr.msk.f32.mxu1 %vm6641_vm4, %v6640_v12 }
 0x3e9   :  { %v1141_v11 = vpop.f32.mrf.mxu1 }
 0x3ea   :  { %v1142_v15 = vadd.f32 %v1141_v11, %v6793_v10 }
 0x3eb   :  { %v6266_v16 = vpop.f32.mrf.mxu1 }
 0x3ec   :  { %v1677_v17 = vsel %vm1068_vm5, %v1142_v15, -inf }
 0x3ed   :  { %v1217_v18 = vpop.f32.mrf.mxu1  ;;  %1678 = vmax.xlane.f32.xlu0 %v1677_v17 }
 0x3ee   :  { %v1218_v19 = vadd.f32 %v1217_v18, %v6793_v10 }
 0x3ef   :  { %v6271_v20 = vpop.f32.mrf.mxu1 }
 0x3f0   :  { %v1680_v21 = vsel %vm1068_vm5, %v1218_v19, -inf }
 0x3f1   :  { %1681 = vmax.xlane.f32.xlu1 %v1680_v21  ;;  %v1293_v13 = vpop.f32.mrf.mxu1 }
 0x3f2   :  { %v1294_v14 = vadd.f32 %v1293_v13, %v6793_v10 }
 0x3f3   :  { %v6276_v22 = vpop.f32.mrf.mxu1 }
 0x3f4   :  { %v1683_v23 = vsel %vm1068_vm5, %v1294_v14, -inf }
 0x3f5   :  { %1684 = vmax.xlane.f32.xlu1 %v1683_v23 }
 0x422   :  { %v1445_v24 = vpop.f32.mrf.mxu0 }
 0x423   :  { %v1446_v27 = vadd.f32 %v1445_v24, %v6793_v10 }
 0x424   :  { %v6286_v28 = vpop.f32.mrf.mxu0 }
 0x425   :  { %v1689_v29 = vsel %vm1068_vm5, %v1446_v27, -inf }
 0x426   :  { %1690 = vmax.xlane.f32.xlu0 %v1689_v29 }
 0x431   :  { %v1369_v30 = vpop.f32.mrf.mxu1 }
 0x432   :  { %v1370_v31 = vadd.f32 %v1369_v30, %v6793_v10 }
 0x433   :  { %v6281_v32 = vpop.f32.mrf.mxu1 }
 0x434   :  { %v1686_v33 = vsel %vm1068_vm5, %v1370_v31, -inf }
 0x435   :  { %1687 = vmax.xlane.f32.xlu1 %v1686_v33  ;;  %v1521_v34 = vpop.f32.mrf.mxu1 }
 0x436   :  { %v1522_v35 = vadd.f32 %v1521_v34, %v6793_v10  ;;  %v1597_v36 = vpop.f32.mrf.mxu0 }
 0x437   :  { %v1598_v37 = vadd.f32 %v1597_v36, %v6793_v10  ;;  %v6291_v38 = vpop.f32.mrf.mxu1 }
 0x438   :  { %v6296_v39 = vpop.f32.mrf.mxu0  ;;  %v1692_v44 = vsel %vm1068_vm5, %v1522_v35, -inf }
 0x439   :  { %1693 = vmax.xlane.f32.xlu1 %v1692_v44  ;;  %v1695_v45 = vsel %vm1068_vm5, %v1598_v37, -inf }
 0x43a   :  { %1696 = vmax.xlane.f32.xlu0 %v1695_v45  ;;  %v1673_v46 = vpop.f32.mrf.mxu1 }
 0x43b   :  { %v1674_v47 = vadd.f32 %v1673_v46, %v6793_v10 }
 0x43c   :  { %v6301_v48 = vpop.f32.mrf.mxu1 }
 0x43d   :  { %v1698_v49 = vsel %vm1068_vm5, %v1674_v47, -inf }
 0x43e   :  { %1699 = vmax.xlane.f32.xlu1 %v1698_v49 }
 0x471   :  { %588 = vxpose.xlu1.b32.start.end [1/1] (short) (narrow) %v6737_v41, 8 }
 0x476   :  { %v1679_v59 = vpop.xlane.xlu0 %1678 }
 0x477   :  { %v1701_v60 = vsub.f32 %v1142_v15, %v1679_v59 }
 0x479   :  { %v1709_v63 = vmul.f32 1.442695, %v1701_v60 }
 0x47a   :  { %v1682_v50 = vpop.xlane.xlu1 %1681 }
 0x47b   :  { %v1702_v51 = vsub.f32 %v1218_v19, %v1682_v50 }
 0x47d   :  { %v1711_v53 = vmul.f32 1.442695, %v1702_v51 }
 0x47e   :  { %v1685_v1 = vpop.xlane.xlu1 %1684 }
 0x47f   :  { %6534 = vpow2.f32 %v1711_v53  ;;  %v1703_v5 = vsub.f32 %v1294_v14, %v1685_v1 }
 0x481   :  { %v1713_v17 = vmul.f32 1.442695, %v1703_v5 }
 0x48c   :  { %v6812_v55 = vpop.eup %6534 }
 0x48d   :  { %v1728_v57 = vsel %vm1068_vm5, %v6812_v55, 0.0 }
 0x498   :  { %1729 = vadd.xlane.f32.xlu1 %v1728_v57 }
 0x4af   :  { %v1691_v61 = vpop.xlane.xlu0 %1690 }
 0x4b0   :  { %v1705_v62 = vsub.f32 %v1446_v27, %v1691_v61 }
 0x4b2   :  { %v1717_v0 = vmul.f32 1.442695, %v1705_v62 }
 0x4b4   :  { %6536 = vpow2.f32 %v1717_v0 }
 0x4b5   :  { %6538 = vpow2.f32 %v1709_v63 }
 0x4be   :  { %v1688_v41 = vpop.xlane.xlu1 %1687 }
 0x4bf   :  { %v1704_v2 = vsub.f32 %v1370_v31, %v1688_v41 }
 0x4c1   :  { %v6816_v3 = vpop.eup %6536  ;;  %v1715_v4 = vmul.f32 1.442695, %v1704_v2 }
 0x4c2   :  { %v1694_v6 = vpop.xlane.xlu1 %1693  ;;  %v1737_v7 = vsel %vm1068_vm5, %v6816_v3, 0.0  ;;  %v6820_v8 = vpop.eup %6538 }
 0x4c3   :  { %6540 = vpow2.f32 %v1715_v4  ;;  %v1706_v9 = vsub.f32 %v1522_v35, %v1694_v6  ;;  %1738 = vadd.xlane.f32.xlu0 %v1737_v7  ;;  %v1697_v11 = vpop.xlane.xlu0 %1696  ;;  %v1725_v19 = vsel %vm1068_vm5, %v6820_v8, 0.0 }
 0x4c4   :  { %v1707_v15 = vsub.f32 %v1598_v37, %v1697_v11 }
 0x4c5   :  { %v1719_v16 = vmul.f32 1.442695, %v1706_v9 }
 0x4c6   :  { %v1721_v18 = vmul.f32 1.442695, %v1707_v15 }
 0x4c7   :  { %6542 = vpow2.f32 %v1719_v16  ;;  %1726 = vadd.xlane.f32.xlu0 %v1725_v19  ;;  %v1700_v20 = vpop.xlane.xlu1 %1699 }
 0x4c8   :  { %6544 = vpow2.f32 %v1721_v18  ;;  %v1708_v21 = vsub.f32 %v1674_v47, %v1700_v20 }
 0x4c9   :  { %6546 = vpow2.f32 %v1713_v17 }
 0x4ca   :  { %v1723_v13 = vmul.f32 1.442695, %v1708_v21  ;;  %v2672_v21 = vld [vmem:[#allocation2 + $0x38] sm:$0xff] }
 0x4cc   :  { %6548 = vpow2.f32 %v1723_v13  ;;  %v2671_v13 = vld [vmem:[#allocation2 + $0x30] sm:$0xff] }
 0x4d0   :  { %v6824_v14 = vpop.eup %6540 }
 0x4d1   :  { %v1734_v22 = vsel %vm1068_vm5, %v6824_v14, 0.0 }
 0x4d2   :  { %1735 = vadd.xlane.f32.xlu1 %v1734_v22  ;;  %v2669_v22 = vld [vmem:[#allocation2 + $0x20] sm:$0xff] }
 0x4d4   :  { %v6828_v23 = vpop.eup %6542 }
 0x4d5   :  { %v6830_v24 = vpop.eup %6544  ;;  %v1740_v27 = vsel %vm1068_vm5, %v6828_v23, 0.0 }
 0x4d6   :  { %1741 = vadd.xlane.f32.xlu1 %v1740_v27  ;;  %v1743_v28 = vsel %vm1068_vm5, %v6830_v24, 0.0  ;;  %v6547_v29 = vpop.eup %6546 }
 0x4d7   :  { %1744 = vadd.xlane.f32.xlu0 %v1743_v28  ;;  %v1731_v31 = vsel %vm1068_vm5, %v6547_v29, 0.0 }
 0x4d9   :  { %v6836_v30 = vpop.eup %6548 }
 0x4da   :  { %v1746_v32 = vsel %vm1068_vm5, %v6836_v30, 0.0 }
 0x4db   :  { %1732 = vadd.xlane.f32.xlu0 %v1731_v31  ;;  %1747 = vadd.xlane.f32.xlu1 %v1746_v32 }
 0x4ed   :  { %v604_v33 = vpop.trf.xlu1 }
 0x4ee   :  { %6308 = vmatpush3.msra.mxu1 %v604_v33 }
 0x4ef   :  { %6317 = vmatprep.subr.mxu1 %v6640_v12 }
 0x508   :  { %556 = vxpose.xlu0.b32.start.end [1/1] (short) (narrow) %v6735_v40, 8 }
 0x50c   :  { %620 = vxpose.xlu0.b32.start.end [1/1] (short) (narrow) %v6739_v42, 8 }
 0x50e   :  { %972 = vxpose.xlu1.b32.start.end [1/1] (short) (narrow) %v6745_v54, 8 }
 0x510   :  { %652 = vxpose.xlu0.b32.start.end [1/1] (short) (narrow) %v6741_v43, 8 }
 0x512   :  { %1036 = vxpose.xlu1.b32.start.end [1/1] (short) (narrow) %v6751_v58, 8 }
 0x514   :  { %940 = vxpose.xlu0.b32.start.end [1/1] (short) (narrow) %v6743_v52, 8 }
 0x518   :  { %1004 = vxpose.xlu0.b32.start.end [1/1] (short) (narrow) %v6747_v56, 8 }
 0x521   :  { %v1730_v34 = vpop.xlane.xlu1 %1729 }
 0x522   :  { %6550 = vrcp.f32 %v1730_v34 }
 0x52f   :  { %v6551_v35 = vpop.eup %6550 }
 0x530   :  { %v1752_v36 = vmul.f32 %v6551_v35, %v6812_v55  ;;  %v6040_v35 = vld [vmem:[%s7110_s4 + $0x1] ss:$0 sm:$0xff] }
 0x532   :  { %6310 = vmatmul.mubr.msk.f32.vlgmr.msra.gmra.mxu1 %vm1068_vm5, %v1752_v36 }
 0x533   :  { %6319 = vmatprep.mubr.msk.f32.mxu1 %vm6641_vm4, %v6640_v12 }
 0x54c   :  { %v1739_v40 = vpop.xlane.xlu0 %1738 }
 0x550   :  { %v1727_v42 = vpop.xlane.xlu0 %1726 }
 0x551   :  { %6552 = vrcp.f32 %v1727_v42 }
 0x55b   :  { %v1736_v43 = vpop.xlane.xlu1 %1735 }
 0x55e   :  { %v6553_v56 = vpop.eup %6552 }
 0x55f   :  { %v1742_v52 = vpop.xlane.xlu1 %1741  ;;  %v1750_v39 = vmul.f32 %v6553_v56, %v6820_v8 }
 0x560   :  { %v1745_v54 = vpop.xlane.xlu0 %1744 }
 0x564   :  { %v1733_v58 = vpop.xlane.xlu0 %1732  ;;  %v1748_v37 = vpop.xlane.xlu1 %1747 }
 0x565   :  { %6554 = vrcp.f32 %v1733_v58 }
 0x566   :  { %6556 = vrcp.f32 %v1736_v43 }
 0x567   :  { %6558 = vrcp.f32 %v1739_v40 }
 0x568   :  { %6560 = vrcp.f32 %v1742_v52 }
 0x569   :  { %6562 = vrcp.f32 %v1745_v54 }
 0x56a   :  { %6564 = vrcp.f32 %v1748_v37 }
 0x572   :  { %v6555_v44 = vpop.eup %6554 }
 0x573   :  { %v1754_v46 = vmul.f32 %v6555_v44, %v6547_v29  ;;  %v6557_v47 = vpop.eup %6556 }
 0x574   :  { %v6559_v49 = vpop.eup %6558  ;;  %v1756_v51 = vmul.f32 %v6557_v47, %v6824_v14  ;;  %v2670_v14 = vld [vmem:[#allocation2 + $0x28] sm:$0xff] }
 0x575   :  { %v6561_v53 = vpop.eup %6560  ;;  %v1758_v59 = vmul.f32 %v6559_v49, %v6816_v3 }
 0x576   :  { %v6563_v55 = vpop.eup %6562  ;;  %v1760_v60 = vmul.f32 %v6561_v53, %v6828_v23  ;;  %v2802_v53 = vld [vmem:[#allocation2 + $0x40] sm:$0xff] }
 0x577   :  { %v6565_v61 = vpop.eup %6564  ;;  %v1762_v0 = vmul.f32 %v6563_v55, %v6830_v24  ;;  %v2901_v55 = vld [vmem:[#allocation2 + $0x98] sm:$0xff] }
 0x578   :  { %v1764_v1 = vmul.f32 %v6565_v61, %v6836_v30 }
 0x584   :  { %v572_v38 = vpop.trf.xlu0 }
 0x585   :  { %6303 = vmatpush3.msra.mxu0 %v572_v38 }
 0x586   :  { %6305 = vmatmul.mubr.msk.f32.vlgmr.msra.gmra.mxu0 %vm1068_vm5, %v1750_v39  ;;  %6312 = vmatprep.subr.mxu0 %v6640_v12 }
 0x587   :  { %6314 = vmatprep.mubr.msk.f32.mxu0 %vm6641_vm4, %v6640_v12 }
 0x588   :  { %v636_v45 = vpop.trf.xlu0 }
 0x589   :  { %6313 = vmatpush3.msra.mxu0 %v636_v45 }
 0x58a   :  { %6315 = vmatmul.mubr.msk.f32.vlgmr.msra.gmra.mxu0 %vm1068_vm5, %v1754_v46  ;;  %6322 = vmatprep.subr.mxu0 %v6640_v12  ;;  %v988_v48 = vpop.trf.xlu1 }
 0x58b   :  { %6324 = vmatprep.mubr.msk.f32.mxu0 %vm6641_vm4, %v6640_v12 }
 0x58c   :  { %v668_v50 = vpop.trf.xlu0 }
 0x58d   :  { %6318 = vmatpush3.msra.mxu1 %v668_v50  ;;  %v2805_v50 = vld [vmem:[#allocation2 + $0x58] sm:$0xff] }
 0x58e   :  { %6320 = vmatmul.mubr.msk.f32.vlgmr.msra.gmra.mxu1 %vm1068_vm5, %v1756_v51  ;;  %6327 = vmatprep.subr.mxu1 %v6640_v12  ;;  %v1052_v62 = vpop.trf.xlu1  ;;  %v2803_v51 = vld [vmem:[#allocation2 + $0x48] sm:$0xff] }
 0x58f   :  { %6328 = vmatpush3.msra.mxu1 %v988_v48  ;;  %6329 = vmatprep.mubr.msk.f32.mxu1 %vm6641_vm4, %v6640_v12 }
 0x590   :  { %v956_v57 = vpop.trf.xlu0  ;;  %6337 = vmatprep.subr.mxu1 %v6640_v12 }
 0x591   :  { %6323 = vmatpush3.msra.mxu0 %v956_v57  ;;  %v2900_v57 = vld [vmem:[#allocation2 + $0x90] sm:$0xff] }
 0x592   :  { %6325 = vmatmul.mubr.msk.f32.vlgmr.msra.gmra.mxu0 %vm1068_vm5, %v1758_v59  ;;  %6330 = vmatmul.mubr.msk.f32.vlgmr.msra.gmra.mxu1 %vm1068_vm5, %v1760_v60  ;;  %v2899_v59 = vld [vmem:[#allocation2 + $0x88] sm:$0xff]  ;;  %v2898_v60 = vld [vmem:[#allocation2 + $0x80] sm:$0xff] }
 0x593   :  { %6332 = vmatprep.subr.mxu0 %v6640_v12  ;;  %6334 = vmatprep.mubr.msk.f32.mxu0 %vm6641_vm4, %v6640_v12 }
 0x594   :  { %v1020_v63 = vpop.trf.xlu0  ;;  %6338 = vmatpush3.msra.mxu1 %v1052_v62  ;;  %6339 = vmatprep.mubr.msk.f32.mxu1 %vm6641_vm4, %v6640_v12 }
 0x595   :  { %6333 = vmatpush3.msra.mxu0 %v1020_v63  ;;  %6353 = vmatprep.subr.mxu1 %v2805_v50 }
 0x596   :  { %6335 = vmatmul.mubr.msk.f32.vlgmr.msra.gmra.mxu0 %vm1068_vm5, %v1762_v0  ;;  %6340 = vmatmul.mubr.msk.f32.vlgmr.msra.gmra.mxu1 %vm1068_vm5, %v1764_v1 }
 0x597   :  { %6342 = vmatprep.subr.mxu0 %v2672_v21  ;;  %6354 = vmatpush3.msra.mxu1 %v2805_v50 }
 0x598   :  { %6343 = vmatpush3.msra.mxu0 %v2672_v21 }
 0x599   :  { %6344 = vmatprep.subr.mxu0 %v2671_v13 }
 0x59a   :  { %6345 = vmatpush3.msra.mxu0 %v2671_v13 }
 0x59b   :  { %6346 = vmatprep.subr.mxu0 %v2670_v14 }
 0x59c   :  { %6347 = vmatpush3.msra.mxu0 %v2670_v14 }
 0x59d   :  { %6348 = vmatprep.subr.mxu0 %v2669_v22 }
 0x59e   :  { %6349 = vmatpush3.msra.mxu0 %v2669_v22 }
 0x59f   :  { %6364 = vmatprep.subr.mxu0 %v2901_v55 }
 0x5f2   :  { %v1907_v41 = vpop.f32.mrf.mxu1 }
 0x5f4   :  { %v6311_v2 = vpop.f32.mrf.mxu1 }
 0x646   :  { %v1834_v3 = vpop.f32.mrf.mxu0 }
 0x647   :  { %2349 = vxpose.xlu0.b32.start.end [1/1] (short) (narrow) %v1834_v3, 8  ;;  %v6043_v3 = vld [vmem:[%s7110_s4 + $0x2] ss:$0 sm:$0xff] }
 0x648   :  { %v6306_v4 = vpop.f32.mrf.mxu0 }
 0x64a   :  { %v1980_v5 = vpop.f32.mrf.mxu0 }
 0x64b   :  { %2381 = vxpose.xlu0.b32.start.end [1/1] (short) (narrow) %v1907_v41, 8 }
 0x64c   :  { %v6316_v6 = vpop.f32.mrf.mxu0 }
 0x64e   :  { %v2053_v7 = vpop.f32.mrf.mxu1 }
 0x64f   :  { %2413 = vxpose.xlu0.b32.start.end [1/1] (short) (narrow) %v1980_v5, 8  ;;  %v6044_v5 = vld [vmem:[%s7110_s4 + $0x3] ss:$0 sm:$0xff] }
 0x650   :  { %v6321_v8 = vpop.f32.mrf.mxu1 }
 0x652   :  { %v2126_v9 = vpop.f32.mrf.mxu0  ;;  %v2199_v11 = vpop.f32.mrf.mxu1 }
 0x653   :  { %2477 = vxpose.xlu1.b32.start.end [1/1] (short) (narrow) %v2126_v9, 8  ;;  %2445 = vxpose.xlu0.b32.start.end [1/1] (short) (narrow) %v2053_v7, 8 }
 0x654   :  { %v6326_v15 = vpop.f32.mrf.mxu0  ;;  %v6331_v16 = vpop.f32.mrf.mxu1 }
 0x655   :  { %v2897_v16 = vld [vmem:[#allocation2 + $0x78] sm:$0xff] }
 0x656   :  { %v2272_v17 = vpop.f32.mrf.mxu0  ;;  %v2345_v18 = vpop.f32.mrf.mxu1 }
 0x657   :  { %2509 = vxpose.xlu1.b32.start.end [1/1] (short) (narrow) %v2199_v11, 8 }
 0x658   :  { %v6336_v19 = vpop.f32.mrf.mxu0  ;;  %v6341_v20 = vpop.f32.mrf.mxu1 }
 0x659   :  { %v2894_v19 = vld [vmem:[#allocation2 + $0x60] sm:$0xff] }
 0x65a   :  { %v6045_v20 = vld [vmem:[%s7110_s4 + $0x4] ss:$0 sm:$0xff] }
 0x65b   :  { %2541 = vxpose.xlu1.b32.start.end [1/1] (short) (narrow) %v2272_v17, 8  ;;  %v2896_v17 = vld [vmem:[#allocation2 + $0x70] sm:$0xff] }
 0x65f   :  { %2573 = vxpose.xlu1.b32.start.end [1/1] (short) (narrow) %v2345_v18, 8  ;;  %v2895_v18 = vld [vmem:[#allocation2 + $0x68] sm:$0xff] }
 0x6c3   :  { %v2365_v23 = vpop.trf.xlu0 }
 0x6c4   :  { %2605 = vxpose.xlu0.b32.start [1/4] (short) (narrow) %v2365_v23, 8 }
 0x6c7   :  { %v2397_v24 = vpop.trf.xlu0 }
 0x6c8   :  { %2606 = vxpose.xlu0.b32.cont [2/4] (short) (narrow) %v2397_v24, 8 }
 0x6cb   :  { %v2429_v27 = vpop.trf.xlu0 }
 0x6cc   :  { %2607 = vxpose.xlu0.b32.cont [3/4] (short) (narrow) %v2429_v27, 8  ;;  %v6048_v27 = vld [vmem:[%s7110_s4 + $0x5] ss:$0 sm:$0xff] }
 0x6cf   :  { %v2493_v28 = vpop.trf.xlu1  ;;  %v2461_v29 = vpop.trf.xlu0 }
 0x6d0   :  { %2637 = vxpose.xlu1.b32.start [1/4] (short) (narrow) %v2493_v28, 8  ;;  %2608 = vxpose.xlu0.b32.end [4/4] (short) (narrow) %v2461_v29, 8 }
 0x6d3   :  { %v2525_v30 = vpop.trf.xlu1 }
 0x6d4   :  { %2638 = vxpose.xlu1.b32.cont [2/4] (short) (narrow) %v2525_v30, 8 }
 0x6d7   :  { %v2557_v31 = vpop.trf.xlu1 }
 0x6d8   :  { %2639 = vxpose.xlu1.b32.cont [3/4] (short) (narrow) %v2557_v31, 8 }
 0x6db   :  { %v2589_v32 = vpop.trf.xlu1 }
 0x6dc   :  { %2640 = vxpose.xlu1.b32.end [4/4] (short) (narrow) %v2589_v32, 8 }
 0x740   :  { %v2621_v33 = vpop.trf.xlu0 }
 0x741   :  { %6350 = vmatprep.mubr.msk.f32.mxu0 %vm154_vm3, %v2621_v33 }
 0x74c   :  { %v2653_v34 = vpop.trf.xlu1 }
 0x74d   :  { %6351 = vmatmul.mubr.msk.f32.vlgmr.msra.gmra.mxu0 %vm154_vm3, %v2653_v34 }
 0x74e   :  { %6365 = vmatpush3.msra.mxu0 %v2901_v55 }
 0x74f   :  { %6366 = vmatprep.subr.mxu0 %v2900_v57 }
 0x750   :  { %6367 = vmatpush3.msra.mxu0 %v2900_v57 }
 0x751   :  { %6368 = vmatprep.subr.mxu0 %v2899_v59 }
 0x752   :  { %6369 = vmatpush3.msra.mxu0 %v2899_v59 }
 0x753   :  { %6370 = vmatprep.subr.mxu0 %v2898_v60 }
 0x754   :  { %6371 = vmatpush3.msra.mxu0 %v2898_v60 }
 0x755   :  { %6372 = vmatprep.subr.mxu0 %v2897_v16 }
 0x756   :  { %6373 = vmatpush3.msra.mxu0 %v2897_v16 }
 0x757   :  { %6374 = vmatprep.subr.mxu0 %v2896_v17 }
 0x758   :  { %6375 = vmatpush3.msra.mxu0 %v2896_v17 }
 0x759   :  { %6376 = vmatprep.subr.mxu0 %v2895_v18 }
 0x75a   :  { %6377 = vmatpush3.msra.mxu0 %v2895_v18 }
 0x75b   :  { %6378 = vmatprep.subr.mxu0 %v2894_v19 }
 0x75c   :  { %6379 = vmatpush3.msra.mxu0 %v2894_v19 }
 0x75d   :  { %6404 = vmatprep.subr.mxu0 %v6640_v12 }
 0x80d   :  { %v6352_v36 = vpop.f32.mrf.mxu0 }
 0x80e   :  { %v2756_v40 = vadd.f32 %v6352_v36, %v6040_v35 }
 0x80f   :  { %v2750_v42 = vpop.f32.mrf.mxu0 }
 0x810   :  { %v2751_v54 = vadd.f32 %v6040_v35, %v2750_v42  ;;  %v2760_v43 = vadd.f32 %v2756_v40, %v6722_v26 }
 0x812   :  { %v2766_v58 = vsel %vm154_vm3, %v2760_v43, 0.0  ;;  %v2759_v52 = vadd.f32 %v2751_v54, %v6720_v25  ;;  %v2804_v25 = vld [vmem:[#allocation2 + $0x50] sm:$0xff] }
 0x813   :  { %2767 = vadd.xlane.f32.xlu1 %v2766_v58  ;;  %6355 = vmatprep.subr.mxu1 %v2804_v25 }
 0x814   :  { %v2763_v56 = vsel %vm154_vm3, %v2759_v52, 0.0  ;;  %6356 = vmatpush3.msra.mxu1 %v2804_v25 }
 0x815   :  { %2764 = vadd.xlane.f32.xlu0 %v2763_v56  ;;  %6357 = vmatprep.subr.mxu1 %v2803_v51 }
 0x816   :  { %6358 = vmatpush3.msra.mxu1 %v2803_v51 }
 0x817   :  { %6359 = vmatprep.subr.mxu1 %v2802_v53 }
 0x818   :  { %6360 = vmatpush3.msra.mxu1 %v2802_v53  ;;  %v6051_v53 = vld [vmem:[%s7110_s4 + $0x6] ss:$0 sm:$0xff] }
 0x89c   :  { %v2768_v37 = vpop.xlane.xlu1 %2767 }
 0x89d   :  { %v2771_v38 = vmul.f32 0.03125, %v2768_v37 }
 0x89e   :  { %v2765_v39 = vpop.xlane.xlu0 %2764 }
 0x89f   :  { %v2770_v44 = vmul.f32 0.03125, %v2765_v39  ;;  %v2773_v45 = vsub.f32 %v2760_v43, %v2771_v38  ;;  %v3033_v39 = vld [vmem:[#allocation2 + $0xb8] sm:$0xff] }
 0x8a0   :  { %6383 = vmatprep.subr.mxu1 %v3033_v39 }
 0x8a1   :  { %v2772_v46 = vsub.f32 %v2759_v52, %v2770_v44  ;;  %v2775_v49 = vmul.f32 %v2773_v45, %v2773_v45  ;;  %v3032_v44 = vld [vmem:[#allocation2 + $0xb0] sm:$0xff] }
 0x8a3   :  { %v2774_v47 = vmul.f32 %v2772_v46, %v2772_v46  ;;  %v2779_v26 = vsel %vm154_vm3, %v2775_v49, 0.0 }
 0x8a5   :  { %v2776_v48 = vsel %vm154_vm3, %v2774_v47, 0.0 }
 0x8a6   :  { %2777 = vadd.xlane.f32.xlu1 %v2776_v48 }
 0x8aa   :  { %2780 = vadd.xlane.f32.xlu1 %v2779_v26 }
 0x92f   :  { %v2778_v61 = vpop.xlane.xlu1 %2777 }
 0x930   :  { %v2782_v62 = vmul.f32 0.03125, %v2778_v61  ;;  %v6052_v61 = vld [vmem:[%s7110_s4 + $0x7] ss:$0 sm:$0xff] }
 0x932   :  { %v2784_v63 = vadd.f32 1e-05, %v2782_v62 }
 0x933   :  { %v2781_v0 = vpop.xlane.xlu1 %2780 }
 0x934   :  { %6566 = vrsqrt.f32 %v2784_v63  ;;  %v2783_v1 = vmul.f32 0.03125, %v2781_v0 }
 0x936   :  { %v2785_v41 = vadd.f32 1e-05, %v2783_v1  ;;  %v6053_v1 = vld [vmem:[%s7110_s4 + $0x8] ss:$0 sm:$0xff] }
 0x938   :  { %6568 = vrsqrt.f32 %v2785_v41 }
 0x941   :  { %v6567_v2 = vpop.eup %6566 }
 0x942   :  { %v2788_v4 = vmul.f32 %v6567_v2, %v2772_v46  ;;  %v3030_v46 = vld [vmem:[#allocation2 + $0xa0] sm:$0xff] }
 0x944   :  { %v2794_v6 = vmul.f32 %v6043_v3, %v2788_v4 }
 0x945   :  { %v6569_v7 = vpop.eup %6568 }
 0x946   :  { %v2789_v8 = vmul.f32 %v6569_v7, %v2773_v45  ;;  %v2800_v9 = vadd.f32 %v6044_v5, %v2794_v6  ;;  %v3031_v45 = vld [vmem:[#allocation2 + $0xa8] sm:$0xff] }
 0x948   :  { %v2795_v11 = vmul.f32 %v6043_v3, %v2789_v8  ;;  %6361 = vmatprep.mubr.msk.f32.mxu1 %vm154_vm3, %v2800_v9 }
 0x94a   :  { %v2801_v15 = vadd.f32 %v6044_v5, %v2795_v11 }
 0x94c   :  { %6362 = vmatmul.mubr.msk.f32.vlgmr.msra.gmra.mxu1 %vm154_vm3, %v2801_v15 }
 0x94d   :  { %6384 = vmatpush3.msra.mxu1 %v3033_v39 }
 0x94e   :  { %6385 = vmatprep.subr.mxu1 %v3032_v44 }
 0x94f   :  { %6386 = vmatpush3.msra.mxu1 %v3032_v44 }
 0x950   :  { %6387 = vmatprep.subr.mxu1 %v3031_v45 }
 0x951   :  { %6388 = vmatpush3.msra.mxu1 %v3031_v45 }
 0x952   :  { %6389 = vmatprep.subr.mxu1 %v3030_v46 }
 0x953   :  { %6390 = vmatpush3.msra.mxu1 %v3030_v46 }
 0x954   :  { %6394 = vmatprep.subr.mxu1 %v6640_v12 }
 0xa0c   :  { %v6363_v21 = vpop.f32.mrf.mxu1 }
 0xa0d   :  { %v2889_v13 = vadd.f32 %v6363_v21, %v6045_v20 }
 0xa0e   :  { %v2883_v14 = vpop.f32.mrf.mxu1 }
 0xa0f   :  { %v2884_v22 = vadd.f32 %v6045_v20, %v2883_v14  ;;  %v2893_v24 = vmax.f32 %v2889_v13, 0.0 }
 0xa11   :  { %v2892_v23 = vmax.f32 %v2884_v22, 0.0 }
 0xa13   :  { %6380 = vmatprep.mubr.msk.f32.mxu0 %vm59_vm0, %v2892_v23 }
 0xa14   :  { %6381 = vmatmul.mubr.msk.f32.vlgmr.msra.gmra.mxu0 %vm59_vm0, %v2893_v24 }
 0xa15   :  { %6406 = vmatprep.mubr.msk.f32.mxu0 %vm6641_vm4, %v6640_v12 }
 0xad4   :  { %v6382_v28 = vpop.f32.mrf.mxu0 }
 0xad5   :  { %v2985_v29 = vadd.f32 %v6382_v28, %v6048_v27 }
 0xad6   :  { %v2979_v30 = vpop.f32.mrf.mxu0 }
 0xad7   :  { %v2980_v31 = vadd.f32 %v6048_v27, %v2979_v30  ;;  %v2989_v32 = vadd.f32 %v2985_v29, %v2801_v15 }
 0xad9   :  { %v2995_v33 = vsel %vm154_vm3, %v2989_v32, 0.0  ;;  %v2988_v34 = vadd.f32 %v2980_v31, %v2800_v9 }
 0xada   :  { %2996 = vadd.xlane.f32.xlu1 %v2995_v33 }
 0xadb   :  { %v2992_v35 = vsel %vm154_vm3, %v2988_v34, 0.0 }
 0xadc   :  { %2993 = vadd.xlane.f32.xlu0 %v2992_v35 }
 0xb63   :  { %v2997_v36 = vpop.xlane.xlu1 %2996 }
 0xb64   :  { %v2999_v40 = vmul.f32 0.03125, %v2997_v36 }
 0xb65   :  { %v2994_v42 = vpop.xlane.xlu0 %2993 }
 0xb66   :  { %v3001_v54 = vsub.f32 %v2989_v32, %v2999_v40  ;;  %v2998_v43 = vmul.f32 0.03125, %v2994_v42 }
 0xb68   :  { %v3000_v58 = vsub.f32 %v2988_v34, %v2998_v43  ;;  %v3003_v52 = vmul.f32 %v3001_v54, %v3001_v54 }
 0xb6a   :  { %v3007_v56 = vsel %vm154_vm3, %v3003_v52, 0.0  ;;  %v3002_v37 = vmul.f32 %v3000_v58, %v3000_v58 }
 0xb6b   :  { %3008 = vadd.xlane.f32.xlu1 %v3007_v56 }
 0xb6c   :  { %v3004_v38 = vsel %vm154_vm3, %v3002_v37, 0.0 }
 0xb6d   :  { %3005 = vadd.xlane.f32.xlu0 %v3004_v38 }
 0xbf4   :  { %v3009_v47 = vpop.xlane.xlu1 %3008 }
 0xbf5   :  { %v3011_v48 = vmul.f32 0.03125, %v3009_v47 }
 0xbf6   :  { %v3006_v49 = vpop.xlane.xlu0 %3005 }
 0xbf7   :  { %v3013_v26 = vadd.f32 1e-05, %v3011_v48  ;;  %v3010_v50 = vmul.f32 0.03125, %v3006_v49 }
 0xbf9   :  { %6570 = vrsqrt.f32 %v3013_v26  ;;  %v3012_v25 = vadd.f32 1e-05, %v3010_v50 }
 0xbfb   :  { %6572 = vrsqrt.f32 %v3012_v25 }
 0xc06   :  { %v6571_v51 = vpop.eup %6570 }
 0xc07   :  { %v3017_v55 = vmul.f32 %v6571_v51, %v3001_v54 }
 0xc08   :  { %v6573_v57 = vpop.eup %6572 }
 0xc09   :  { %v3016_v59 = vmul.f32 %v6573_v57, %v3000_v58  ;;  %v3023_v60 = vmul.f32 %v6051_v53, %v3017_v55 }
 0xc0b   :  { %v3022_v62 = vmul.f32 %v6051_v53, %v3016_v59  ;;  %v6924_v0 = vadd.f32 %v6052_v61, %v3023_v60 }
 0xc0d   :  { %v6922_v63 = vadd.f32 %v6052_v61, %v3022_v62 }
 0xc0f   :  { %6391 = vmatprep.mubr.msk.f32.mxu1 %vm154_vm3, %v6922_v63 }
 0xc10   :  { %6392 = vmatmul.mubr.msk.f32.vlgmr.msra.gmra.mxu1 %vm154_vm3, %v6924_v0 }
 0xc11   :  { %6396 = vmatprep.mubr.msk.f32.mxu1 %vm6641_vm4, %v6640_v12 }
 0xcd0   :  { %v6393_v41 = vpop.f32.mrf.mxu1 }
 0xcd1   :  { %v3117_v2 = vadd.f32 %v6393_v41, %v6053_v1 }
 0xcd2   :  { %v3111_v3 = vpop.f32.mrf.mxu1 }
 0xcd3   :  { %v3112_v4 = vadd.f32 %v6053_v1, %v3111_v3  ;;  %3152 = vxpose.xlu1.b32.start.end [1/1] (short) (narrow) %v3117_v2, 96 }
 0xcd5   :  { %3120 = vxpose.xlu0.b32.start.end [1/1] (short) (narrow) %v3112_v4, 96 }
 0xd4f   :  { %v3168_v5 = vpop.trf.xlu1 }
 0xd51   :  { %v3136_v6 = vpop.trf.xlu0 }
 0xd52   :  { %3184 = vxpose.xlu1.b32.start.end [1/1] (short) (narrow) %v3136_v6, 8 }
 0xd53   :  { %v3169_v7 = vpop.trf.xlu1 }
 0xd55   :  { %v3137_v8 = vpop.trf.xlu0 }
 0xd56   :  { %3216 = vxpose.xlu0.b32.start.end [1/1] (short) (narrow) %v3137_v8, 8 }
 0xd57   :  { %v3170_v9 = vpop.trf.xlu1 }
 0xd59   :  { %v3138_v11 = vpop.trf.xlu0 }
 0xd5a   :  { %3248 = vxpose.xlu0.b32.start.end [1/1] (short) (narrow) %v3138_v11, 8 }
 0xd5b   :  { %v3171_v15 = vpop.trf.xlu1 }
 0xd5d   :  { %v3139_v16 = vpop.trf.xlu0 }
 0xd5e   :  { %3280 = vxpose.xlu0.b32.start.end [1/1] (short) (narrow) %v3139_v16, 8 }
 0xd5f   :  { %v3172_v17 = vpop.trf.xlu1 }
 0xd60   :  { %3696 = vxpose.xlu1.b32.start.end [1/1] (short) (narrow) %v3172_v17, 8 }
 0xd61   :  { %v3140_v18 = vpop.trf.xlu0 }
 0xd62   :  { %3312 = vxpose.xlu0.b32.start.end [1/1] (short) (narrow) %v3140_v18, 8 }
 0xd63   :  { %v3173_v19 = vpop.trf.xlu1 }
 0xd64   :  { %3728 = vxpose.xlu1.b32.start.end [1/1] (short) (narrow) %v3173_v19, 8 }
 0xd65   :  { %v3141_v20 = vpop.trf.xlu0 }
 0xd66   :  { %3344 = vxpose.xlu0.b32.start.end [1/1] (short) (narrow) %v3141_v20, 8 }
 0xd67   :  { %v3174_v14 = vpop.trf.xlu1 }
 0xd69   :  { %v3142_v21 = vpop.trf.xlu0 }
 0xd6a   :  { %3376 = vxpose.xlu0.b32.start.end [1/1] (short) (narrow) %v3142_v21, 8 }
 0xd6b   :  { %v3175_v22 = vpop.trf.xlu1 }
 0xd6d   :  { %v3143_v13 = vpop.trf.xlu0 }
 0xd6e   :  { %3568 = vxpose.xlu0.b32.start.end [1/1] (short) (narrow) %v3168_v5, 8  ;;  %3408 = vxpose.xlu1.b32.start.end [1/1] (short) (narrow) %v3143_v13, 8 }
 0xd6f   :  { %v6937_v27 = vpop.trf.xlu1 }
 0xd71   :  { %v3144_v23 = vpop.trf.xlu0 }
 0xd72   :  { %3600 = vxpose.xlu0.b32.start.end [1/1] (short) (narrow) %v3169_v7, 8  ;;  %3760 = vxpose.xlu1.b32.start.end [1/1] (short) (narrow) %v3174_v14, 8 }
 0xd73   :  { %v6941_v29 = vpop.trf.xlu1 }
 0xd75   :  { %v6935_v24 = vpop.trf.xlu0 }
 0xd76   :  { %3632 = vxpose.xlu0.b32.start.end [1/1] (short) (narrow) %v3170_v9, 8  ;;  %3792 = vxpose.xlu1.b32.start.end [1/1] (short) (narrow) %v3175_v22, 8 }
 0xd77   :  { %v6945_v31 = vpop.trf.xlu1 }
 0xd79   :  { %v6939_v28 = vpop.trf.xlu0 }
 0xd7a   :  { %3664 = vxpose.xlu1.b32.start.end [1/1] (short) (narrow) %v3171_v15, 8  ;;  %3440 = vxpose.xlu0.b32.start.end [1/1] (short) (narrow) %v3144_v23, 8 }
 0xd7b   :  { %v6947_v33 = vpop.trf.xlu1 }
 0xd7d   :  { %v6943_v30 = vpop.trf.xlu0 }
 0xdce   :  { %v3200_v35 = vpop.trf.xlu1 }
 0xdd2   :  { %v3232_v32 = vpop.trf.xlu0 }
 0xdd6   :  { %v3264_v34 = vpop.trf.xlu0 }
 0xdda   :  { %v3296_v36 = vpop.trf.xlu0 }
 0xddc   :  { %v3712_v42 = vpop.trf.xlu1 }
 0xdde   :  { %v3328_v40 = vpop.trf.xlu0 }
 0xddf   :  { %6395 = vmatpush3.xpose.msk.msra.mxu1 %vm1068_vm5, %v3328_v40 }
 0xde0   :  { %6399 = vmatprep.subr.mxu1 %v6640_v12  ;;  %v3744_v43 = vpop.trf.xlu1 }
 0xde2   :  { %6397 = vmatmul.mubr.msk.f32.vlgmr.msra.gmra.mxu1 %vm1068_vm5, %v3200_v35  ;;  %v3360_v54 = vpop.trf.xlu0 }
 0xde3   :  { %6400 = vmatpush3.xpose.msk.msra.mxu1 %vm1068_vm5, %v3360_v54  ;;  %6401 = vmatprep.mubr.msk.f32.mxu1 %vm6641_vm4, %v6640_v12 }
 0xde4   :  { %6409 = vmatprep.subr.mxu1 %v6640_v12 }
 0xde6   :  { %6402 = vmatmul.mubr.msk.f32.vlgmr.msra.gmra.mxu1 %vm1068_vm5, %v3232_v32  ;;  %v3392_v58 = vpop.trf.xlu0 }
 0xde7   :  { %6405 = vmatpush3.xpose.msk.msra.mxu0 %vm1068_vm5, %v3392_v58  ;;  %6411 = vmatprep.mubr.msk.f32.mxu1 %vm6641_vm4, %v6640_v12 }
 0xde8   :  { %6414 = vmatprep.subr.mxu0 %v6640_v12 }
 0xdea   :  { %v3424_v52 = vpop.trf.xlu1  ;;  %6407 = vmatmul.mubr.msk.f32.vlgmr.msra.gmra.mxu0 %vm1068_vm5, %v3264_v34  ;;  %v3584_v56 = vpop.trf.xlu0 }
 0xdeb   :  { %6410 = vmatpush3.xpose.msk.msra.mxu1 %vm1068_vm5, %v3424_v52  ;;  %6415 = vmatpush3.xpose.msk.msra.mxu0 %vm1068_vm5, %v3712_v42 }
 0xdec   :  { %6416 = vmatprep.mubr.msk.f32.mxu0 %vm6641_vm4, %v6640_v12  ;;  %6419 = vmatprep.subr.mxu1 %v6640_v12 }
 0xded   :  { %6424 = vmatprep.subr.mxu0 %v6640_v12 }
 0xdee   :  { %v3776_v37 = vpop.trf.xlu1  ;;  %6412 = vmatmul.mubr.msk.f32.vlgmr.msra.gmra.mxu1 %vm1068_vm5, %v3296_v36  ;;  %6417 = vmatmul.mubr.msk.f32.vlgmr.msra.gmra.mxu0 %vm1068_vm5, %v3584_v56  ;;  %v3616_v38 = vpop.trf.xlu0 }
 0xdef   :  { %6420 = vmatpush3.xpose.msk.msra.mxu1 %vm1068_vm5, %v3744_v43  ;;  %6425 = vmatpush3.xpose.msk.msra.mxu0 %vm1068_vm5, %v3776_v37 }
 0xdf0   :  { %6421 = vmatprep.mubr.msk.f32.mxu1 %vm6641_vm4, %v6640_v12  ;;  %6426 = vmatprep.mubr.msk.f32.mxu0 %vm6641_vm4, %v6640_v12 }
 0xdf1   :  { %6429 = vmatprep.subr.mxu1 %v6640_v12  ;;  %6434 = vmatprep.subr.mxu0 %v6640_v12 }
 0xdf2   :  { %v3808_v39 = vpop.trf.xlu1  ;;  %6422 = vmatmul.mubr.msk.f32.vlgmr.msra.gmra.mxu1 %vm1068_vm5, %v3616_v38  ;;  %v3648_v44 = vpop.trf.xlu0 }
 0xdf3   :  { %6427 = vmatmul.mubr.msk.f32.vlgmr.msra.gmra.mxu0 %vm1068_vm5, %v3648_v44  ;;  %6430 = vmatpush3.xpose.msk.msra.mxu1 %vm1068_vm5, %v3808_v39 }
 0xdf4   :  { %6431 = vmatprep.mubr.msk.f32.mxu1 %vm6641_vm4, %v6640_v12  ;;  %6436 = vmatprep.mubr.msk.f32.mxu0 %vm6641_vm4, %v6640_v12 }
 0xdf5   :  { %6439 = vmatprep.subr.mxu1 %v6640_v12 }
 0xdf6   :  { %v3680_v45 = vpop.trf.xlu1  ;;  %v3456_v46 = vpop.trf.xlu0 }
 0xdf7   :  { %6432 = vmatmul.mubr.msk.f32.vlgmr.msra.gmra.mxu1 %vm1068_vm5, %v3680_v45  ;;  %6435 = vmatpush3.msra.mxu0 %v3456_v46 }
 0xdf8   :  { %6441 = vmatprep.mubr.msk.f32.mxu1 %vm6641_vm4, %v6640_v12  ;;  %6444 = vmatprep.subr.mxu0 %v6640_v12 }
 0xea2   :  { %v4024_v47 = vpop.f32.mrf.mxu1 }
 0xea3   :  { %v4025_v48 = vadd.f32 %v4024_v47, %v6793_v10 }
 0xea4   :  { %v6398_v49 = vpop.f32.mrf.mxu1 }
 0xea5   :  { %v4560_v26 = vsel %vm1068_vm5, %v4025_v48, -inf }
 0xea6   :  { %4561 = vmax.xlane.f32.xlu0 %v4560_v26  ;;  %v4100_v50 = vpop.f32.mrf.mxu1 }
 0xea7   :  { %v4101_v25 = vadd.f32 %v4100_v50, %v6793_v10 }
 0xea8   :  { %v6403_v51 = vpop.f32.mrf.mxu1 }
 0xea9   :  { %v4563_v53 = vsel %vm1068_vm5, %v4101_v25, -inf }
 0xeaa   :  { %4564 = vmax.xlane.f32.xlu1 %v4563_v53  ;;  %v4176_v55 = vpop.f32.mrf.mxu0 }
 0xeab   :  { %v4177_v57 = vadd.f32 %v4176_v55, %v6793_v10 }
 0xeac   :  { %v6408_v59 = vpop.f32.mrf.mxu0 }
 0xead   :  { %v4566_v60 = vsel %vm1068_vm5, %v4177_v57, -inf }
 0xeae   :  { %v4252_v61 = vpop.f32.mrf.mxu1  ;;  %4567 = vmax.xlane.f32.xlu1 %v4566_v60  ;;  %v4328_v62 = vpop.f32.mrf.mxu0 }
 0xeaf   :  { %v4253_v1 = vadd.f32 %v4252_v61, %v6793_v10  ;;  %v4329_v41 = vadd.f32 %v4328_v62, %v6793_v10 }
 0xeb0   :  { %v6413_v2 = vpop.f32.mrf.mxu1  ;;  %v6418_v3 = vpop.f32.mrf.mxu0 }
 0xeb1   :  { %v4569_v4 = vsel %vm1068_vm5, %v4253_v1, -inf  ;;  %v4572_v5 = vsel %vm1068_vm5, %v4329_v41, -inf }
 0xeb2   :  { %4570 = vmax.xlane.f32.xlu1 %v4569_v4  ;;  %4573 = vmax.xlane.f32.xlu0 %v4572_v5  ;;  %v4404_v6 = vpop.f32.mrf.mxu1 }
 0xeb3   :  { %v4405_v7 = vadd.f32 %v4404_v6, %v6793_v10  ;;  %v4480_v8 = vpop.f32.mrf.mxu0 }
 0xeb4   :  { %v4481_v9 = vadd.f32 %v4480_v8, %v6793_v10  ;;  %v6423_v11 = vpop.f32.mrf.mxu1 }
 0xeb5   :  { %v6428_v15 = vpop.f32.mrf.mxu0  ;;  %v4575_v16 = vsel %vm1068_vm5, %v4405_v7, -inf }
 0xeb6   :  { %4576 = vmax.xlane.f32.xlu1 %v4575_v16  ;;  %v4578_v17 = vsel %vm1068_vm5, %v4481_v9, -inf }
 0xeb7   :  { %v4556_v18 = vpop.f32.mrf.mxu1  ;;  %4579 = vmax.xlane.f32.xlu0 %v4578_v17 }
 0xeb8   :  { %v4557_v19 = vadd.f32 %v4556_v18, %v6793_v10 }
 0xeb9   :  { %v6433_v20 = vpop.f32.mrf.mxu1 }
 0xeba   :  { %v4581_v21 = vsel %vm1068_vm5, %v4557_v19, -inf }
 0xebb   :  { %4582 = vmax.xlane.f32.xlu1 %v4581_v21 }
 0xee4   :  { %3504 = vxpose.xlu0.b32.start.end [1/1] (short) (narrow) %v6939_v28, 8 }
 0xeee   :  { %3472 = vxpose.xlu1.b32.start.end [1/1] (short) (narrow) %v6935_v24, 8 }
 0xf2f   :  { %v4562_v13 = vpop.xlane.xlu0 %4561 }
 0xf30   :  { %v4584_v14 = vsub.f32 %v4025_v48, %v4562_v13 }
 0xf32   :  { %v4592_v22 = vmul.f32 1.442695, %v4584_v14 }
 0xf33   :  { %v4565_v23 = vpop.xlane.xlu1 %4564 }
 0xf34   :  { %6574 = vpow2.f32 %v4592_v22  ;;  %v4585_v32 = vsub.f32 %v4101_v25, %v4565_v23 }
 0xf36   :  { %v4594_v34 = vmul.f32 1.442695, %v4585_v32 }
 0xf37   :  { %v4568_v35 = vpop.xlane.xlu1 %4567 }
 0xf38   :  { %6576 = vpow2.f32 %v4594_v34  ;;  %v4586_v36 = vsub.f32 %v4177_v57, %v4568_v35 }
 0xf3a   :  { %v4596_v40 = vmul.f32 1.442695, %v4586_v36 }
 0xf3b   :  { %v4571_v10 = vpop.xlane.xlu1 %4570  ;;  %v4574_v42 = vpop.xlane.xlu0 %4573 }
 0xf3c   :  { %6578 = vpow2.f32 %v4596_v40  ;;  %v4587_v54 = vsub.f32 %v4253_v1, %v4571_v10  ;;  %v4588_v43 = vsub.f32 %v4329_v41, %v4574_v42 }
 0xf3e   :  { %v4598_v58 = vmul.f32 1.442695, %v4587_v54  ;;  %v4600_v28 = vmul.f32 1.442695, %v4588_v43 }
 0xf3f   :  { %v4577_v52 = vpop.xlane.xlu1 %4576 }
 0xf40   :  { %6580 = vpow2.f32 %v4598_v58  ;;  %v4589_v24 = vsub.f32 %v4405_v7, %v4577_v52  ;;  %v4580_v56 = vpop.xlane.xlu0 %4579 }
 0xf41   :  { %v6575_v37 = vpop.eup %6574  ;;  %6582 = vpow2.f32 %v4600_v28  ;;  %v4590_v38 = vsub.f32 %v4481_v9, %v4580_v56 }
 0xf42   :  { %v4602_v39 = vmul.f32 1.442695, %v4589_v24  ;;  %v4608_v44 = vsel %vm1068_vm5, %v6575_v37, 0.0 }
 0xf43   :  { %v4604_v45 = vmul.f32 1.442695, %v4590_v38  ;;  %4609 = vadd.xlane.f32.xlu0 %v4608_v44 }
 0xf44   :  { %6584 = vpow2.f32 %v4602_v39  ;;  %v4583_v46 = vpop.xlane.xlu1 %4582 }
 0xf45   :  { %v6577_v47 = vpop.eup %6576  ;;  %6586 = vpow2.f32 %v4604_v45  ;;  %v4591_v48 = vsub.f32 %v4557_v19, %v4583_v46 }
 0xf46   :  { %v4611_v49 = vsel %vm1068_vm5, %v6577_v47, 0.0 }
 0xf47   :  { %v4606_v26 = vmul.f32 1.442695, %v4591_v48  ;;  %4612 = vadd.xlane.f32.xlu1 %v4611_v49  ;;  %v5555_v48 = vld [vmem:[#allocation2 + $0xd8] sm:$0xff]  ;;  %v5554_v49 = vld [vmem:[#allocation2 + $0xd0] sm:$0xff] }
 0xf49   :  { %v6579_v50 = vpop.eup %6578  ;;  %6588 = vpow2.f32 %v4606_v26  ;;  %v5553_v26 = vld [vmem:[#allocation2 + $0xc8] sm:$0xff] }
 0xf4a   :  { %v4614_v25 = vsel %vm1068_vm5, %v6579_v50, 0.0 }
 0xf4b   :  { %4615 = vadd.xlane.f32.xlu0 %v4614_v25 }
 0xf4d   :  { %v6581_v51 = vpop.eup %6580 }
 0xf4e   :  { %v6583_v53 = vpop.eup %6582  ;;  %v4617_v55 = vsel %vm1068_vm5, %v6581_v51, 0.0 }
 0xf4f   :  { %4618 = vadd.xlane.f32.xlu1 %v4617_v55  ;;  %v4620_v57 = vsel %vm1068_vm5, %v6583_v53, 0.0 }
 0xf50   :  { %4621 = vadd.xlane.f32.xlu0 %v4620_v57 }
 0xf51   :  { %v7013_v59 = vpop.eup %6584 }
 0xf52   :  { %v7015_v60 = vpop.eup %6586  ;;  %v4623_v61 = vsel %vm1068_vm5, %v7013_v59, 0.0 }
 0xf53   :  { %4624 = vadd.xlane.f32.xlu1 %v4623_v61  ;;  %v4626_v62 = vsel %vm1068_vm5, %v7015_v60, 0.0 }
 0xf54   :  { %4627 = vadd.xlane.f32.xlu0 %v4626_v62 }
 0xf56   :  { %v7021_v1 = vpop.eup %6588 }
 0xf57   :  { %v4629_v41 = vsel %vm1068_vm5, %v7021_v1, 0.0 }
 0xf58   :  { %4630 = vadd.xlane.f32.xlu1 %v4629_v41  ;;  %v6080_v41 = vld [vmem:[%s7110_s4 + $0x9] ss:$0 sm:$0xff] }
 0xf60   :  { %v3520_v3 = vpop.trf.xlu0 }
 0xf6a   :  { %v3488_v2 = vpop.trf.xlu1 }
 0xf6b   :  { %6440 = vmatpush3.msra.mxu1 %v3488_v2 }
 0xf6c   :  { %6449 = vmatprep.subr.mxu1 %v6640_v12 }
 0xf81   :  { %3536 = vxpose.xlu0.b32.start.end [1/1] (short) (narrow) %v6943_v30, 8 }
 0xf85   :  { %3824 = vxpose.xlu0.b32.start.end [1/1] (short) (narrow) %v6937_v27, 8 }
 0xf89   :  { %3888 = vxpose.xlu0.b32.start.end [1/1] (short) (narrow) %v6945_v31, 8 }
 0xf8b   :  { %3856 = vxpose.xlu1.b32.start.end [1/1] (short) (narrow) %v6941_v29, 8 }
 0xf8f   :  { %3920 = vxpose.xlu1.b32.start.end [1/1] (short) (narrow) %v6947_v33, 8 }
 0xfcc   :  { %v4610_v4 = vpop.xlane.xlu0 %4609 }
 0xfcd   :  { %6590 = vrcp.f32 %v4610_v4 }
 0xfd0   :  { %v4613_v5 = vpop.xlane.xlu1 %4612 }
 0xfd1   :  { %6592 = vrcp.f32 %v4613_v5 }
 0xfd4   :  { %v4616_v6 = vpop.xlane.xlu0 %4615 }
 0xfd5   :  { %6594 = vrcp.f32 %v4616_v6 }
 0xfd8   :  { %v4619_v33 = vpop.xlane.xlu1 %4618 }
 0xfd9   :  { %v4622_v9 = vpop.xlane.xlu0 %4621  ;;  %6596 = vrcp.f32 %v4619_v33 }
 0xfda   :  { %v6591_v7 = vpop.eup %6590  ;;  %6598 = vrcp.f32 %v4622_v9 }
 0xfdb   :  { %v4633_v8 = vmul.f32 %v6591_v7, %v6575_v37 }
 0xfdc   :  { %v4625_v11 = vpop.xlane.xlu1 %4624 }
 0xfdd   :  { %6437 = vmatmul.mubr.msk.f32.vlgmr.msra.gmra.mxu0 %vm1068_vm5, %v4633_v8  ;;  %v4628_v15 = vpop.xlane.xlu0 %4627 }
 0xfde   :  { %v6593_v30 = vpop.eup %6592  ;;  %6445 = vmatpush3.msra.mxu0 %v3520_v3  ;;  %6446 = vmatprep.mubr.msk.f32.mxu0 %vm6641_vm4, %v6640_v12  ;;  %6600 = vrcp.f32 %v4628_v15 }
 0xfdf   :  { %v4635_v27 = vmul.f32 %v6593_v30, %v6577_v47  ;;  %6454 = vmatprep.subr.mxu0 %v6640_v12  ;;  %6602 = vrcp.f32 %v4625_v11 }
 0xfe1   :  { %6442 = vmatmul.mubr.msk.f32.vlgmr.msra.gmra.mxu1 %vm1068_vm5, %v4635_v27  ;;  %v4631_v16 = vpop.xlane.xlu1 %4630 }
 0xfe2   :  { %v6595_v29 = vpop.eup %6594  ;;  %6451 = vmatprep.mubr.msk.f32.mxu1 %vm6641_vm4, %v6640_v12  ;;  %6604 = vrcp.f32 %v4631_v16 }
 0xfe3   :  { %v4637_v31 = vmul.f32 %v6595_v29, %v6579_v50  ;;  %v5552_v50 = vld [vmem:[#allocation2 + $0xc0] sm:$0xff] }
 0xfe5   :  { %6447 = vmatmul.mubr.msk.f32.vlgmr.msra.gmra.mxu0 %vm1068_vm5, %v4637_v31 }
 0xfe6   :  { %6456 = vmatprep.mubr.msk.f32.mxu0 %vm6641_vm4, %v6640_v12  ;;  %v6597_v17 = vpop.eup %6596 }
 0xfe7   :  { %v4639_v19 = vmul.f32 %v6597_v17, %v6581_v51  ;;  %v6599_v20 = vpop.eup %6598 }
 0xfe8   :  { %v4641_v13 = vmul.f32 %v6599_v20, %v6583_v53  ;;  %v5684_v20 = vld [vmem:[#allocation2 + $0xe0] sm:$0xff] }
 0xfeb   :  { %v6601_v14 = vpop.eup %6600 }
 0xfec   :  { %v6603_v22 = vpop.eup %6602  ;;  %v4645_v32 = vmul.f32 %v6601_v14, %v7015_v60  ;;  %v5781_v14 = vld [vmem:[#allocation2 + $0x128] sm:$0xff] }
 0xfed   :  { %v4643_v35 = vmul.f32 %v6603_v22, %v7013_v59  ;;  %v5780_v22 = vld [vmem:[#allocation2 + $0x120] sm:$0xff] }
 0xfef   :  { %v6605_v36 = vpop.eup %6604 }
 0xff0   :  { %v4647_v10 = vmul.f32 %v6605_v36, %v7021_v1 }
 0xffd   :  { %v3552_v18 = vpop.trf.xlu0 }
 0xffe   :  { %6450 = vmatpush3.msra.mxu1 %v3552_v18  ;;  %v5686_v18 = vld [vmem:[#allocation2 + $0xf0] sm:$0xff] }
 0xfff   :  { %6452 = vmatmul.mubr.msk.f32.vlgmr.msra.gmra.mxu1 %vm1068_vm5, %v4639_v19  ;;  %6459 = vmatprep.subr.mxu1 %v6640_v12  ;;  %v5685_v19 = vld [vmem:[#allocation2 + $0xe8] sm:$0xff] }
0x1000   :  { %6461 = vmatprep.mubr.msk.f32.mxu1 %vm6641_vm4, %v6640_v12 }
0x1001   :  { %v3840_v21 = vpop.trf.xlu0 }
0x1002   :  { %6455 = vmatpush3.msra.mxu0 %v3840_v21  ;;  %v5783_v21 = vld [vmem:[#allocation2 + $0x138] sm:$0xff] }
0x1003   :  { %6457 = vmatmul.mubr.msk.f32.vlgmr.msra.gmra.mxu0 %vm1068_vm5, %v4641_v13  ;;  %6464 = vmatprep.subr.mxu0 %v6640_v12  ;;  %v5782_v13 = vld [vmem:[#allocation2 + $0x130] sm:$0xff] }
0x1004   :  { %6466 = vmatprep.mubr.msk.f32.mxu0 %vm6641_vm4, %v6640_v12 }
0x1005   :  { %v3904_v23 = vpop.trf.xlu0 }
0x1006   :  { %6465 = vmatpush3.msra.mxu0 %v3904_v23 }
0x1007   :  { %v3872_v34 = vpop.trf.xlu1  ;;  %6467 = vmatmul.mubr.msk.f32.vlgmr.msra.gmra.mxu0 %vm1068_vm5, %v4645_v32  ;;  %6474 = vmatprep.subr.mxu0 %v5555_v48 }
0x1008   :  { %6460 = vmatpush3.msra.mxu1 %v3872_v34  ;;  %6475 = vmatpush3.msra.mxu0 %v5555_v48 }
0x1009   :  { %6462 = vmatmul.mubr.msk.f32.vlgmr.msra.gmra.mxu1 %vm1068_vm5, %v4643_v35  ;;  %6469 = vmatprep.subr.mxu1 %v6640_v12 }
0x100a   :  { %6471 = vmatprep.mubr.msk.f32.mxu1 %vm6641_vm4, %v6640_v12  ;;  %6476 = vmatprep.subr.mxu0 %v5554_v49 }
0x100b   :  { %v3936_v40 = vpop.trf.xlu1  ;;  %6477 = vmatpush3.msra.mxu0 %v5554_v49 }
0x100c   :  { %6470 = vmatpush3.msra.mxu1 %v3936_v40  ;;  %6478 = vmatprep.subr.mxu0 %v5553_v26 }
0x100d   :  { %6472 = vmatmul.mubr.msk.f32.vlgmr.msra.gmra.mxu1 %vm1068_vm5, %v4647_v10  ;;  %6479 = vmatpush3.msra.mxu0 %v5553_v26 }
0x100e   :  { %6480 = vmatprep.subr.mxu0 %v5552_v50 }
0x100f   :  { %6481 = vmatpush3.msra.mxu0 %v5552_v50 }
0x1010   :  { %6496 = vmatprep.subr.mxu0 %v5783_v21 }
0x109d   :  { %v4717_v42 = vpop.f32.mrf.mxu0 }
0x109e   :  { %5232 = vxpose.xlu0.b32.start.end [1/1] (short) (narrow) %v4717_v42, 8  ;;  %v6083_v42 = vld [vmem:[%s7110_s4 + $0xa] ss:$0 sm:$0xff] }
0x109f   :  { %v6438_v54 = vpop.f32.mrf.mxu0 }
0x10a1   :  { %v4790_v43 = vpop.f32.mrf.mxu1 }
0x10a2   :  { %5264 = vxpose.xlu0.b32.start.end [1/1] (short) (narrow) %v4790_v43, 8  ;;  %v6084_v43 = vld [vmem:[%s7110_s4 + $0xb] ss:$0 sm:$0xff] }
0x10a3   :  { %v6443_v58 = vpop.f32.mrf.mxu1 }
0x10a5   :  { %v4863_v28 = vpop.f32.mrf.mxu0 }
0x10a6   :  { %5296 = vxpose.xlu0.b32.start.end [1/1] (short) (narrow) %v4863_v28, 8 }
0x10a7   :  { %v6448_v52 = vpop.f32.mrf.mxu0 }
0x10bf   :  { %v4936_v24 = vpop.f32.mrf.mxu1 }
0x10c0   :  { %5328 = vxpose.xlu0.b32.start.end [1/1] (short) (narrow) %v4936_v24, 8 }
0x10c1   :  { %v6453_v56 = vpop.f32.mrf.mxu1 }
0x10c3   :  { %v5009_v37 = vpop.f32.mrf.mxu0 }
0x10c4   :  { %5360 = vxpose.xlu1.b32.start.end [1/1] (short) (narrow) %v5009_v37, 8 }
0x10c5   :  { %v6458_v12 = vpop.f32.mrf.mxu0 }
0x10c6   :  { %v5779_v12 = vld [vmem:[#allocation2 + $0x118] sm:$0xff] }
0x10c7   :  { %v5155_v38 = vpop.f32.mrf.mxu0 }
0x10c9   :  { %v5082_v39 = vpop.f32.mrf.mxu1  ;;  %v6468_v44 = vpop.f32.mrf.mxu0 }
0x10ca   :  { %5392 = vxpose.xlu1.b32.start.end [1/1] (short) (narrow) %v5082_v39, 8  ;;  %v5777_v39 = vld [vmem:[#allocation2 + $0x108] sm:$0xff]  ;;  %v5776_v44 = vld [vmem:[#allocation2 + $0x100] sm:$0xff] }
0x10cb   :  { %v6463_v45 = vpop.f32.mrf.mxu1 }
0x10cc   :  { %v6085_v45 = vld [vmem:[%s7110_s4 + $0xc] ss:$0 sm:$0xff] }
0x10cd   :  { %v5228_v46 = vpop.f32.mrf.mxu1 }
0x10ce   :  { %5424 = vxpose.xlu1.b32.start.end [1/1] (short) (narrow) %v5155_v38, 8  ;;  %v5778_v38 = vld [vmem:[#allocation2 + $0x110] sm:$0xff] }
0x10cf   :  { %v6473_v47 = vpop.f32.mrf.mxu1 }
0x10d2   :  { %5456 = vxpose.xlu1.b32.start.end [1/1] (short) (narrow) %v5228_v46, 8 }
0x111a   :  { %v5248_v25 = vpop.trf.xlu0 }
0x111b   :  { %5488 = vxpose.xlu0.b32.start [1/4] (short) (narrow) %v5248_v25, 8  ;;  %v6088_v25 = vld [vmem:[%s7110_s4 + $0xd] ss:$0 sm:$0xff] }
0x111e   :  { %v5280_v51 = vpop.trf.xlu0 }
0x111f   :  { %5489 = vxpose.xlu0.b32.cont [2/4] (short) (narrow) %v5280_v51, 8 }
0x1122   :  { %v5312_v53 = vpop.trf.xlu0 }
0x1123   :  { %5490 = vxpose.xlu0.b32.cont [3/4] (short) (narrow) %v5312_v53, 8 }
0x113c   :  { %v5344_v55 = vpop.trf.xlu0 }
0x113d   :  { %5491 = vxpose.xlu0.b32.end [4/4] (short) (narrow) %v5344_v55, 8 }
0x1140   :  { %v5376_v57 = vpop.trf.xlu1 }
0x1141   :  { %5520 = vxpose.xlu1.b32.start [1/4] (short) (narrow) %v5376_v57, 8 }
0x1146   :  { %v5408_v59 = vpop.trf.xlu1 }
0x1147   :  { %5521 = vxpose.xlu1.b32.cont [2/4] (short) (narrow) %v5408_v59, 8 }
0x114a   :  { %v5440_v60 = vpop.trf.xlu1 }
0x114b   :  { %5522 = vxpose.xlu1.b32.cont [3/4] (short) (narrow) %v5440_v60, 8 }
0x114e   :  { %v5472_v61 = vpop.trf.xlu1 }
0x114f   :  { %5523 = vxpose.xlu1.b32.end [4/4] (short) (narrow) %v5472_v61, 8 }
0x11ad   :  { %v5504_v62 = vpop.trf.xlu0 }
0x11ae   :  { %6482 = vmatprep.mubr.msk.f32.mxu0 %vm154_vm3, %v5504_v62 }
0x11bf   :  { %v5536_v1 = vpop.trf.xlu1 }
0x11c0   :  { %6483 = vmatmul.mubr.msk.f32.vlgmr.msra.gmra.mxu0 %vm154_vm3, %v5536_v1 }
0x11c1   :  { %6497 = vmatpush3.msra.mxu0 %v5783_v21 }
0x11c2   :  { %6498 = vmatprep.subr.mxu0 %v5782_v13 }
0x11c3   :  { %6499 = vmatpush3.msra.mxu0 %v5782_v13 }
0x11c4   :  { %6500 = vmatprep.subr.mxu0 %v5781_v14 }
0x11c5   :  { %6501 = vmatpush3.msra.mxu0 %v5781_v14  ;;  %v6092_v14 = vld [vmem:[%s7110_s4 + $0xf] ss:$0 sm:$0xff] }
0x11c6   :  { %6502 = vmatprep.subr.mxu0 %v5780_v22 }
0x11c7   :  { %6503 = vmatpush3.msra.mxu0 %v5780_v22 }
0x11c8   :  { %6504 = vmatprep.subr.mxu0 %v5779_v12 }
0x11c9   :  { %6505 = vmatpush3.msra.mxu0 %v5779_v12 }
0x11ca   :  { %6506 = vmatprep.subr.mxu0 %v5778_v38 }
0x11cb   :  { %6507 = vmatpush3.msra.mxu0 %v5778_v38 }
0x11cc   :  { %6508 = vmatprep.subr.mxu0 %v5777_v39 }
0x11cd   :  { %6509 = vmatpush3.msra.mxu0 %v5777_v39 }
0x11ce   :  { %6510 = vmatprep.subr.mxu0 %v5776_v44 }
0x11cf   :  { %6511 = vmatpush3.msra.mxu0 %v5776_v44 }
0x1280   :  { %v6484_v2 = vpop.f32.mrf.mxu0 }
0x1281   :  { %v5639_v3 = vadd.f32 %v6484_v2, %v6080_v41 }
0x1282   :  { %v5633_v4 = vpop.f32.mrf.mxu0 }
0x1283   :  { %v5643_v5 = vadd.f32 %v5639_v3, %v6924_v0  ;;  %v5634_v6 = vadd.f32 %v6080_v41, %v5633_v4 }
0x1285   :  { %v5642_v7 = vadd.f32 %v5634_v6, %v6922_v63  ;;  %v5649_v8 = vsel %vm154_vm3, %v5643_v5, 0.0  ;;  %v5687_v63 = vld [vmem:[#allocation2 + $0xf8] sm:$0xff] }
0x1286   :  { %5650 = vadd.xlane.f32.xlu1 %v5649_v8  ;;  %6485 = vmatprep.subr.mxu1 %v5687_v63 }
0x1287   :  { %v5646_v30 = vsel %vm154_vm3, %v5642_v7, 0.0  ;;  %6486 = vmatpush3.msra.mxu1 %v5687_v63 }
0x1288   :  { %5647 = vadd.xlane.f32.xlu0 %v5646_v30  ;;  %6487 = vmatprep.subr.mxu1 %v5686_v18 }
0x1289   :  { %6488 = vmatpush3.msra.mxu1 %v5686_v18  ;;  %v6091_v18 = vld [vmem:[%s7110_s4 + $0xe] ss:$0 sm:$0xff] }
0x128a   :  { %6489 = vmatprep.subr.mxu1 %v5685_v19 }
0x128b   :  { %6490 = vmatpush3.msra.mxu1 %v5685_v19 }
0x128c   :  { %6491 = vmatprep.subr.mxu1 %v5684_v20 }
0x128d   :  { %6492 = vmatpush3.msra.mxu1 %v5684_v20 }
0x130f   :  { %v5651_v27 = vpop.xlane.xlu1 %5650 }
0x1310   :  { %v5653_v29 = vmul.f32 0.03125, %v5651_v27  ;;  %v5915_v27 = vld [vmem:[#allocation2 + $0x158] sm:$0xff] }
0x1311   :  { %v5648_v31 = vpop.xlane.xlu0 %5647  ;;  %6515 = vmatprep.subr.mxu1 %v5915_v27 }
0x1312   :  { %v5652_v33 = vmul.f32 0.03125, %v5648_v31  ;;  %v5655_v9 = vsub.f32 %v5643_v5, %v5653_v29  ;;  %v5914_v29 = vld [vmem:[#allocation2 + $0x150] sm:$0xff]  ;;  %v5913_v31 = vld [vmem:[#allocation2 + $0x148] sm:$0xff] }
0x1314   :  { %v5654_v11 = vsub.f32 %v5642_v7, %v5652_v33  ;;  %v5657_v17 = vmul.f32 %v5655_v9, %v5655_v9  ;;  %v5912_v33 = vld [vmem:[#allocation2 + $0x140] sm:$0xff] }
0x1316   :  { %v5656_v15 = vmul.f32 %v5654_v11, %v5654_v11  ;;  %v5661_v0 = vsel %vm154_vm3, %v5657_v17, 0.0 }
0x1318   :  { %v5658_v16 = vsel %vm154_vm3, %v5656_v15, 0.0 }
0x1319   :  { %5659 = vadd.xlane.f32.xlu1 %v5658_v16 }
0x131d   :  { %5662 = vadd.xlane.f32.xlu1 %v5661_v0 }
0x13a2   :  { %v5660_v23 = vpop.xlane.xlu1 %5659 }
0x13a3   :  { %v5664_v32 = vmul.f32 0.03125, %v5660_v23 }
0x13a5   :  { %v5666_v34 = vadd.f32 1e-05, %v5664_v32 }
0x13a6   :  { %v5663_v35 = vpop.xlane.xlu1 %5662 }
0x13a7   :  { %6606 = vrsqrt.f32 %v5666_v34  ;;  %v5665_v36 = vmul.f32 0.03125, %v5663_v35  ;;  %v6093_v34 = vld [vmem:[%s7110_s4 + $0x10] ss:$0 sm:$0xff] }
0x13a9   :  { %v5667_v40 = vadd.f32 1e-05, %v5665_v36 }
0x13ab   :  { %6608 = vrsqrt.f32 %v5667_v40 }
0x13b4   :  { %v6607_v10 = vpop.eup %6606 }
0x13b5   :  { %v5670_v54 = vmul.f32 %v6607_v10, %v5654_v11 }
0x13b7   :  { %v5676_v58 = vmul.f32 %v6083_v42, %v5670_v54 }
0x13b8   :  { %v6609_v28 = vpop.eup %6608 }
0x13b9   :  { %v5671_v52 = vmul.f32 %v6609_v28, %v5655_v9  ;;  %v5682_v24 = vadd.f32 %v6084_v43, %v5676_v58 }
0x13bb   :  { %v5677_v56 = vmul.f32 %v6083_v42, %v5671_v52  ;;  %6493 = vmatprep.mubr.msk.f32.mxu1 %vm154_vm3, %v5682_v24 }
0x13bd   :  { %v5683_v37 = vadd.f32 %v6084_v43, %v5677_v56 }
0x13bf   :  { %6494 = vmatmul.mubr.msk.f32.vlgmr.msra.gmra.mxu1 %vm154_vm3, %v5683_v37 }
0x13c0   :  { %6516 = vmatpush3.msra.mxu1 %v5915_v27 }
0x13c1   :  { %6517 = vmatprep.subr.mxu1 %v5914_v29 }
0x13c2   :  { %6518 = vmatpush3.msra.mxu1 %v5914_v29 }
0x13c3   :  { %6519 = vmatprep.subr.mxu1 %v5913_v31 }
0x13c4   :  { %6520 = vmatpush3.msra.mxu1 %v5913_v31 }
0x13c5   :  { %6521 = vmatprep.subr.mxu1 %v5912_v33 }
0x13c6   :  { %6522 = vmatpush3.msra.mxu1 %v5912_v33 }
0x147f   :  { %v6495_v46 = vpop.f32.mrf.mxu1 }
0x1480   :  { %v5771_v47 = vadd.f32 %v6495_v46, %v6085_v45 }
0x1481   :  { %v5765_v48 = vpop.f32.mrf.mxu1 }
0x1482   :  { %v5766_v49 = vadd.f32 %v6085_v45, %v5765_v48  ;;  %v5775_v50 = vmax.f32 %v5771_v47, 0.0 }
0x1484   :  { %v5774_v26 = vmax.f32 %v5766_v49, 0.0 }
0x1486   :  { %6512 = vmatprep.mubr.msk.f32.mxu0 %vm59_vm0, %v5774_v26 }
0x1487   :  { %6513 = vmatmul.mubr.msk.f32.vlgmr.msra.gmra.mxu0 %vm59_vm0, %v5775_v50 }
0x1547   :  { %v6514_v51 = vpop.f32.mrf.mxu0 }
0x1548   :  { %v5867_v53 = vadd.f32 %v6514_v51, %v6088_v25 }
0x1549   :  { %v5861_v55 = vpop.f32.mrf.mxu0 }
0x154a   :  { %v5871_v57 = vadd.f32 %v5867_v53, %v5683_v37  ;;  %v5862_v59 = vadd.f32 %v6088_v25, %v5861_v55 }
0x154c   :  { %v5870_v60 = vadd.f32 %v5862_v59, %v5682_v24  ;;  %v5877_v61 = vsel %vm154_vm3, %v5871_v57, 0.0 }
0x154d   :  { %5878 = vadd.xlane.f32.xlu1 %v5877_v61 }
0x154e   :  { %v5874_v62 = vsel %vm154_vm3, %v5870_v60, 0.0 }
0x154f   :  { %5875 = vadd.xlane.f32.xlu0 %v5874_v62 }
0x15d6   :  { %v5879_v1 = vpop.xlane.xlu1 %5878 }
0x15d7   :  { %v5881_v41 = vmul.f32 0.03125, %v5879_v1 }
0x15d8   :  { %v5876_v2 = vpop.xlane.xlu0 %5875 }
0x15d9   :  { %v5883_v3 = vsub.f32 %v5871_v57, %v5881_v41  ;;  %v5880_v4 = vmul.f32 0.03125, %v5876_v2 }
0x15db   :  { %v5882_v5 = vsub.f32 %v5870_v60, %v5880_v4  ;;  %v5885_v6 = vmul.f32 %v5883_v3, %v5883_v3 }
0x15dd   :  { %v5889_v7 = vsel %vm154_vm3, %v5885_v6, 0.0  ;;  %v5884_v8 = vmul.f32 %v5882_v5, %v5882_v5 }
0x15de   :  { %5890 = vadd.xlane.f32.xlu1 %v5889_v7 }
0x15df   :  { %v5886_v30 = vsel %vm154_vm3, %v5884_v8, 0.0 }
0x15e0   :  { %5887 = vadd.xlane.f32.xlu0 %v5886_v30 }
0x1667   :  { %v5891_v9 = vpop.xlane.xlu1 %5890 }
0x1668   :  { %v5893_v11 = vmul.f32 0.03125, %v5891_v9 }
0x1669   :  { %v5888_v15 = vpop.xlane.xlu0 %5887 }
0x166a   :  { %v5895_v16 = vadd.f32 1e-05, %v5893_v11  ;;  %v5892_v17 = vmul.f32 0.03125, %v5888_v15 }
0x166c   :  { %6610 = vrsqrt.f32 %v5895_v16  ;;  %v5894_v0 = vadd.f32 1e-05, %v5892_v17 }
0x166e   :  { %6612 = vrsqrt.f32 %v5894_v0 }
0x1679   :  { %v6611_v63 = vpop.eup %6610 }
0x167a   :  { %v5899_v19 = vmul.f32 %v6611_v63, %v5883_v3 }
0x167b   :  { %v6613_v20 = vpop.eup %6612 }
0x167c   :  { %v5898_v21 = vmul.f32 %v6613_v20, %v5882_v5  ;;  %v5905_v13 = vmul.f32 %v6091_v18, %v5899_v19 }
0x167e   :  { %v5904_v22 = vmul.f32 %v6091_v18, %v5898_v21  ;;  %v5911_v32 = vadd.f32 %v6092_v14, %v5905_v13 }
0x1680   :  { %v5910_v23 = vadd.f32 %v6092_v14, %v5904_v22 }
0x1682   :  { %6523 = vmatprep.mubr.msk.f32.mxu1 %vm154_vm3, %v5910_v23 }
0x1683   :  { %6524 = vmatmul.mubr.msk.f32.vlgmr.msra.gmra.mxu1 %vm154_vm3, %v5911_v32 }
0x1743   :  { %v6525_v35 = vpop.f32.mrf.mxu1 }
0x1744   :  { %v5999_v36 = vadd.f32 %v6525_v35, %v6093_v34 }
0x1745   :  { %v5993_v40 = vpop.f32.mrf.mxu1 }
0x1746   :  { %6003 = vst [vmem:[%s7111_s5 + $0x8] sm:$0xff] %v5999_v36  ;;  %v5994_v10 = vadd.f32 %v6093_v34, %v5993_v40 }
0x1748   :  { %6002 = vst [vmem:[%s7111_s5] sm:$0xff] %v5994_v10 }
0x1749   :  { %6008 = vsyncpa [#allocation3], 1 }

</bundles_post_ra>
